<compile_context>
chip_gen: v6e
topology: v6e:2x2x1
jax: 0.10.0
libtpu: 0.0.40
codegen_flags: <defaults>
</compile_context>

<pallas_src>
import jax
import jax.numpy as jnp
from jax.experimental import pallas as pl
from jax.experimental.pallas import tpu as pltpu


# ------------------------------ activations -------------------------------- #

def _sigmoid(y):
    # Exact sigmoid (exp goes to the EUP); review flagged approx reciprocal.
    return 1.0 / (1.0 + jnp.exp(-y))


def _silu(y):
    return y * _sigmoid(y)


# ------------------------------ fused kernel -------------------------------- #

def _fused_kernel(patch_ref, sw_ref, ew_ref, dww_ref, s1w_ref, s2w_ref,
                  pw_ref, hw_ref, f1w_ref, f2w_ref, vec_ref,
                  out_ref, pad_ref):
    """One batch element per grid step; all intermediates stay in VMEM."""
    Hp, Wp, Ce = pad_ref.shape
    H, W = Hp - 2, Wp - 2
    HW = H * W
    Cs = sw_ref.shape[1]
    Cse = s1w_ref.shape[1]
    Cemb = hw_ref.shape[1]
    F1 = f1w_ref.shape[1]
    Od = f2w_ref.shape[1]

    # Packed per-channel shift / bias vectors (static slices are free).
    vecs = vec_ref[...]                                   # (9, 128)
    stem_sh = vecs[0:1, :Cs]
    exp_sh = vecs[1:2, :Ce]
    dw_sh = vecs[2:3, :Ce]
    se1_b = vecs[3:4, :Cse]
    se2_b = vecs[4:5, :Ce]
    proj_sh = vecs[5:6, :Cs]
    head_sh = vecs[6:7, :Cemb]
    fc1_b = vecs[7:8, :F1]
    fc2_b = vecs[8:9, :Od]

    # Stem conv (im2col matmul, BN scale folded into weight) + shift + SiLU.
    x = patch_ref[0]                                      # (HW, Kp) bf16
    y = jnp.dot(x, sw_ref[...], preferred_element_type=jnp.float32)
    y = _silu(y + stem_sh)                                # (HW, Cs) residual

    # MBConv expand 1x1 + folded BN + SiLU.
    e = jnp.dot(y.astype(jnp.bfloat16), ew_ref[...],
                preferred_element_type=jnp.float32)
    e = _silu(e + exp_sh)                                 # (HW, Ce)

    # Depthwise 3x3, stride 1, pad 1: zero-pad inside a VMEM scratch
    # (no XLA pad / HBM round trip); 9 taps are static slices.
    pad_ref[...] = jnp.zeros_like(pad_ref)
    pad_ref[1:1 + H, 1:1 + W, :] = e.reshape(H, W, Ce)
    hp = pad_ref[...]                                     # (Hp, Wp, Ce)
    wdw = dww_ref[...]                                    # (3, 3, Ce), BN-folded
    acc = hp[0:H, 0:W, :] * wdw[0, 0]
    for i in range(3):
        for j in range(3):
            if i == 0 and j == 0:
                continue
            acc = acc + hp[i:i + H, j:j + W, :] * wdw[i, j]
    h = _silu(acc + dw_sh)                                # (H, W, Ce)
    hm = h.reshape(HW, Ce)

    # Squeeze-and-excite (GAP + FC/SiLU + FC/sigmoid gate).
    s = jnp.mean(hm, axis=0, keepdims=True)               # (1, Ce)
    g = _silu(jnp.dot(s, s1w_ref[...],
                      preferred_element_type=jnp.float32) + se1_b)
    g = _sigmoid(jnp.dot(g, s2w_ref[...],
                         preferred_element_type=jnp.float32) + se2_b)
    hm = hm * g                                           # (HW, Ce)

    # Project 1x1 + folded BN, residual add with the stem output.
    z = jnp.dot(hm.astype(jnp.bfloat16), pw_ref[...],
                preferred_element_type=jnp.float32)
    z = z + proj_sh + y                                   # (HW, Cs)

    # Head 1x1 + folded BN + SiLU, then global average pool.
    t = jnp.dot(z.astype(jnp.bfloat16), hw_ref[...],
                preferred_element_type=jnp.float32)
    t = _silu(t + head_sh)                                # (HW, Cemb)
    feat = jnp.mean(t, axis=0, keepdims=True)             # (1, Cemb)

    # Classifier MLP: Linear -> ReLU -> [Dropout=identity] -> Linear.
    u = jnp.maximum(
        jnp.dot(feat, f1w_ref[...], preferred_element_type=jnp.float32) + fc1_b,
        0.0)                                              # (1, F1)
    out_ref[0] = jnp.dot(u, f2w_ref[...],
                         preferred_element_type=jnp.float32) + fc2_b


# ------------------------------ wrappers ------------------------------------ #

def pack_params(p):
    """One-time (outside jit) BN fold + packing: zero runtime cost."""
    kh, kw, cin, cs = p["stem_w"].shape
    K = kh * kw * cin
    Kp = ((K + 7) // 8) * 8                               # 27 -> 32 sublane pad
    ce = p["exp_w"].shape[-1]
    cemb = p["head_w"].shape[-1]

    def pad_row(v):
        v = v.reshape(-1).astype(jnp.float32)
        return jnp.pad(v, (0, 128 - v.shape[0]))          # assumes C <= 128 here

    stem_w = p["stem_w"].reshape(K, cs) * p["stem_scale"][None, :]
    stem_w = jnp.pad(stem_w, ((0, Kp - K), (0, 0)))
    return {
        "stem_w": stem_w.astype(jnp.bfloat16),
        "exp_w": (p["exp_w"].reshape(cs, ce)
                  * p["exp_scale"][None, :]).astype(jnp.bfloat16),
        "dw_w": (p["dw_w"] * p["dw_scale"][None, None, :]).astype(jnp.float32),
        "se1_w": p["se1_w"].astype(jnp.float32),
        "se2_w": p["se2_w"].astype(jnp.float32),
        "proj_w": (p["proj_w"].reshape(ce, cs)
                   * p["proj_scale"][None, :]).astype(jnp.bfloat16),
        "head_w": (p["head_w"].reshape(cs, cemb)
                   * p["head_scale"][None, :]).astype(jnp.bfloat16),
        "fc1_w": p["fc"][0][0].astype(jnp.float32),
        "fc2_w": p["fc"][1][0].astype(jnp.float32),
        "vecs": jnp.stack([
            pad_row(p["stem_shift"]), pad_row(p["exp_shift"]),
            pad_row(p["dw_shift"]), pad_row(p["se1_b"]),
            pad_row(p["se2_b"]), pad_row(p["proj_shift"]),
            pad_row(p["head_shift"]), pad_row(p["fc"][0][1]),
            pad_row(p["fc"][1][1])], axis=0),             # (9, 128) f32
    }


def efficientnet_spec_forward(packed, x_nchw):
    x = jnp.transpose(x_nchw, (0, 2, 3, 1)).astype(jnp.float32)  # NCHW -> NHWC
    B, H, W, Cin = x.shape
    kh = kw = 3
    stride, pad = 2, 1
    Ho = (H + 2 * pad - kh) // stride + 1
    Wo = (W + 2 * pad - kw) // stride + 1
    HW = Ho * Wo
    K = kh * kw * Cin
    Kp = packed["stem_w"].shape[0]
    Cs = packed["stem_w"].shape[1]
    Ce = packed["exp_w"].shape[1]
    Cse = packed["se1_w"].shape[1]
    Cemb = packed["head_w"].shape[1]
    F1 = packed["fc1_w"].shape[1]
    Od = packed["fc2_w"].shape[1]

    # im2col for the stride-2 stem conv (tiny XLA glue; contraction padded to 32).
    # TODO(synk): at real resolutions move this gather in-kernel (9x HBM blowup).
    xp = jnp.pad(x, ((0, 0), (pad, pad), (pad, pad), (0, 0)))
    cols = [xp[:, i:i + (Ho - 1) * stride + 1:stride,
                  j:j + (Wo - 1) * stride + 1:stride, :]
            for i in range(kh) for j in range(kw)]
    patches = jnp.concatenate(cols, axis=-1).reshape(B, HW, K)
    patches = jnp.pad(patches, ((0, 0), (0, 0), (0, Kp - K))).astype(jnp.bfloat16)

    const2 = lambda b: (0, 0)
    out = pl.pallas_call(
        _fused_kernel,
        out_shape=jax.ShapeDtypeStruct((B, 1, Od), jnp.float32),
        grid=(B,),
        in_specs=[
            pl.BlockSpec((1, HW, Kp), lambda b: (b, 0, 0)),
            pl.BlockSpec((Kp, Cs), const2),
            pl.BlockSpec((Cs, Ce), const2),
            pl.BlockSpec((3, 3, Ce), lambda b: (0, 0, 0)),
            pl.BlockSpec((Ce, Cse), const2),
            pl.BlockSpec((Cse, Ce), const2),
            pl.BlockSpec((Ce, Cs), const2),
            pl.BlockSpec((Cs, Cemb), const2),
            pl.BlockSpec((Cemb, F1), const2),
            pl.BlockSpec((F1, Od), const2),
            pl.BlockSpec((9, 128), const2),
        ],
        out_specs=pl.BlockSpec((1, 1, Od), lambda b: (b, 0, 0)),
        scratch_shapes=[pltpu.VMEM((Ho + 2, Wo + 2, Ce), jnp.float32)],
        compiler_params=pltpu.CompilerParams(
            dimension_semantics=("parallel",)),
    )(patches, packed["stem_w"], packed["exp_w"], packed["dw_w"],
      packed["se1_w"], packed["se2_w"], packed["proj_w"], packed["head_w"],
      packed["fc1_w"], packed["fc2_w"], packed["vecs"])
    return out.reshape(B, Od)


# --------------------------- parameters -------------------------------------- #

def init_params(key, cin=3, stem_c=16, exp_c=64, se_c=4,
                embedding_dim=64, fcs=(32,), out_dim=8):
    keys = iter(jax.random.split(key, 64))

    def nk():
        return next(keys)

    def conv_w(kh, kw, ci, co):  # kaiming-normal style
        return jax.random.normal(nk(), (kh, kw, ci, co), jnp.float32) * jnp.sqrt(
            2.0 / (kh * kw * ci))

    def bn_fold(c, eps=1e-3):  # eval-mode BatchNorm folded to scale/shift
        gamma = 1.0 + 0.1 * jax.random.normal(nk(), (c,), jnp.float32)
        beta = 0.1 * jax.random.normal(nk(), (c,), jnp.float32)
        mean = 0.1 * jax.random.normal(nk(), (c,), jnp.float32)
        var = jax.random.uniform(nk(), (c,), jnp.float32, minval=0.5, maxval=1.5)
        scale = gamma / jnp.sqrt(var + eps)
        shift = beta - mean * scale
        return scale, shift

    p = {}
    p["stem_w"] = conv_w(3, 3, cin, stem_c)
    p["stem_scale"], p["stem_shift"] = bn_fold(stem_c)
    p["exp_w"] = conv_w(1, 1, stem_c, exp_c)
    p["exp_scale"], p["exp_shift"] = bn_fold(exp_c)
    p["dw_w"] = jax.random.normal(nk(), (3, 3, exp_c), jnp.float32) * jnp.sqrt(2.0 / 9.0)
    p["dw_scale"], p["dw_shift"] = bn_fold(exp_c)
    p["se1_w"] = jax.random.normal(nk(), (exp_c, se_c), jnp.float32) * jnp.sqrt(2.0 / exp_c)
    p["se1_b"] = 0.01 * jax.random.normal(nk(), (se_c,), jnp.float32)
    p["se2_w"] = jax.random.normal(nk(), (se_c, exp_c), jnp.float32) * jnp.sqrt(2.0 / se_c)
    p["se2_b"] = 0.01 * jax.random.normal(nk(), (exp_c,), jnp.float32)
    p["proj_w"] = conv_w(1, 1, exp_c, stem_c)
    p["proj_scale"], p["proj_shift"] = bn_fold(stem_c)
    p["head_w"] = conv_w(1, 1, stem_c, embedding_dim)
    p["head_scale"], p["head_shift"] = bn_fold(embedding_dim)

    dims = [embedding_dim] + list(fcs) + [out_dim]
    fc = []
    for i in range(1, len(dims)):
        w = jax.random.normal(nk(), (dims[i - 1], dims[i]), jnp.float32) * jnp.sqrt(
            2.0 / dims[i - 1])                     # nn.init.kaiming_normal_
        b = 0.01 * jax.random.normal(nk(), (dims[i],), jnp.float32)
        fc.append((w, b))
    p["fc"] = fc
    return p


if __name__ == "__main__":
    key = jax.random.PRNGKey(0)
    pkey, xkey = jax.random.split(key)
    params = init_params(pkey, cin=3, stem_c=16, exp_c=64, se_c=4,
                         embedding_dim=64, fcs=(32,), out_dim=8)
    packed = jax.tree_util.tree_map(jnp.asarray, pack_params(params))  # once, outside jit
    x = jax.random.normal(xkey, (2, 3, 16, 16), jnp.float32)  # NCHW like PyTorch
    fwd = jax.jit(efficientnet_spec_forward)
    out = fwd(packed, x)
    jax.block_until_ready(out)
    assert out.shape == (2, 8) and out.dtype == jnp.float32
    print("KERNEL_OK")
</pallas_src>

<mosaic_0001>
module attributes {stable_mosaic.version = 11 : i64} {
  func.func @_fused_kernel(%arg0: i32, %arg1: memref<1x64x32xbf16, #tpu.memory_space<vmem>>, %arg2: memref<32x16xbf16, #tpu.memory_space<vmem>>, %arg3: memref<16x64xbf16, #tpu.memory_space<vmem>>, %arg4: memref<3x3x64xf32, #tpu.memory_space<vmem>>, %arg5: memref<64x4xf32, #tpu.memory_space<vmem>>, %arg6: memref<4x64xf32, #tpu.memory_space<vmem>>, %arg7: memref<64x16xbf16, #tpu.memory_space<vmem>>, %arg8: memref<16x64xbf16, #tpu.memory_space<vmem>>, %arg9: memref<64x32xf32, #tpu.memory_space<vmem>>, %arg10: memref<32x8xf32, #tpu.memory_space<vmem>>, %arg11: memref<9x128xf32, #tpu.memory_space<vmem>>, %arg12: memref<1x1x8xf32, #tpu.memory_space<vmem>>, %arg13: memref<10x10x64xf32, #tpu.memory_space<vmem>>) attributes {dimension_semantics = [#tpu.dimension_semantics<parallel>], iteration_bounds = array<i64: 2>, scalar_prefetch = 0 : i64, scratch_operands = 1 : i64, tpu.core_type = #tpu.core_type<tc>, window_params = [{transform_indices = @transform_0, window_bounds = array<i64: 1, 64, 32>}, {pipeline_mode = #tpu.pipeline_mode<synchronous>, transform_indices = @transform_1, window_bounds = array<i64: 32, 16>}, {pipeline_mode = #tpu.pipeline_mode<synchronous>, transform_indices = @transform_2, window_bounds = array<i64: 16, 64>}, {pipeline_mode = #tpu.pipeline_mode<synchronous>, transform_indices = @transform_3, window_bounds = array<i64: 3, 3, 64>}, {pipeline_mode = #tpu.pipeline_mode<synchronous>, transform_indices = @transform_4, window_bounds = array<i64: 64, 4>}, {pipeline_mode = #tpu.pipeline_mode<synchronous>, transform_indices = @transform_5, window_bounds = array<i64: 4, 64>}, {pipeline_mode = #tpu.pipeline_mode<synchronous>, transform_indices = @transform_6, window_bounds = array<i64: 64, 16>}, {pipeline_mode = #tpu.pipeline_mode<synchronous>, transform_indices = @transform_7, window_bounds = array<i64: 16, 64>}, {pipeline_mode = #tpu.pipeline_mode<synchronous>, transform_indices = @transform_8, window_bounds = array<i64: 64, 32>}, {pipeline_mode = #tpu.pipeline_mode<synchronous>, transform_indices = @transform_9, window_bounds = array<i64: 32, 8>}, {pipeline_mode = #tpu.pipeline_mode<synchronous>, transform_indices = @transform_10, window_bounds = array<i64: 9, 128>}, {transform_indices = @transform_11, window_bounds = array<i64: 1, 1, 8>}]} {
    %c0 = arith.constant 0 : index
    %c0_0 = arith.constant 0 : index
    %0 = vector.load %arg11[%c0, %c0_0] : memref<9x128xf32, #tpu.memory_space<vmem>>, vector<9x128xf32>
    %1 = vector.extract_strided_slice %0 {offsets = [0, 0], sizes = [1, 16], strides = [1, 1]} : vector<9x128xf32> to vector<1x16xf32>
    %2 = vector.extract_strided_slice %0 {offsets = [1, 0], sizes = [1, 64], strides = [1, 1]} : vector<9x128xf32> to vector<1x64xf32>
    %3 = vector.extract_strided_slice %0 {offsets = [2, 0], sizes = [1, 64], strides = [1, 1]} : vector<9x128xf32> to vector<1x64xf32>
    %4 = vector.extract_strided_slice %0 {offsets = [3, 0], sizes = [1, 4], strides = [1, 1]} : vector<9x128xf32> to vector<1x4xf32>
    %5 = vector.extract_strided_slice %0 {offsets = [4, 0], sizes = [1, 64], strides = [1, 1]} : vector<9x128xf32> to vector<1x64xf32>
    %6 = vector.extract_strided_slice %0 {offsets = [5, 0], sizes = [1, 16], strides = [1, 1]} : vector<9x128xf32> to vector<1x16xf32>
    %7 = vector.extract_strided_slice %0 {offsets = [6, 0], sizes = [1, 64], strides = [1, 1]} : vector<9x128xf32> to vector<1x64xf32>
    %8 = vector.extract_strided_slice %0 {offsets = [7, 0], sizes = [1, 32], strides = [1, 1]} : vector<9x128xf32> to vector<1x32xf32>
    %9 = vector.extract_strided_slice %0 {offsets = [8, 0], sizes = [1, 8], strides = [1, 1]} : vector<9x128xf32> to vector<1x8xf32>
    %c0_1 = arith.constant 0 : index
    %c0_2 = arith.constant 0 : index
    %c0_3 = arith.constant 0 : index
    %10 = vector.load %arg1[%c0_1, %c0_2, %c0_3] : memref<1x64x32xbf16, #tpu.memory_space<vmem>>, vector<1x64x32xbf16>
    %11 = vector.shape_cast %10 : vector<1x64x32xbf16> to vector<64x32xbf16>
    %c0_4 = arith.constant 0 : index
    %c0_5 = arith.constant 0 : index
    %12 = vector.load %arg2[%c0_4, %c0_5] : memref<32x16xbf16, #tpu.memory_space<vmem>>, vector<32x16xbf16>
    %cst = arith.constant dense<0.000000e+00> : vector<64x16xf32>
    %13 = tpu.matmul %11, %12, %cst {dimension_numbers = #tpu.dot_dimension_numbers<[1], [0], [0], [1], [0, 0, 1, 1], [], []>} : vector<64x32xbf16>, vector<32x16xbf16>, vector<64x16xf32> -> vector<64x16xf32>
    %14 = vector.broadcast %1 : vector<1x16xf32> to vector<64x16xf32>
    %15 = arith.addf %13, %14 : vector<64x16xf32>
    %cst_6 = arith.constant 0.000000e+00 : f32
    %16 = vector.broadcast %cst_6 : f32 to vector<64x16xf32>
    %17 = arith.subf %16, %15 : vector<64x16xf32>
    %18 = math.exp %17 : vector<64x16xf32>
    %cst_7 = arith.constant 1.000000e+00 : f32
    %19 = vector.broadcast %cst_7 : f32 to vector<64x16xf32>
    %20 = arith.addf %19, %18 : vector<64x16xf32>
    %cst_8 = arith.constant 1.000000e+00 : f32
    %21 = vector.broadcast %cst_8 : f32 to vector<64x16xf32>
    %22 = arith.divf %21, %20 : vector<64x16xf32>
    %23 = arith.mulf %15, %22 : vector<64x16xf32>
    %24 = arith.truncf %23 : vector<64x16xf32> to vector<64x16xbf16>
    %c0_9 = arith.constant 0 : index
    %c0_10 = arith.constant 0 : index
    %25 = vector.load %arg3[%c0_9, %c0_10] : memref<16x64xbf16, #tpu.memory_space<vmem>>, vector<16x64xbf16>
    %cst_11 = arith.constant dense<0.000000e+00> : vector<64x64xf32>
    %26 = tpu.matmul %24, %25, %cst_11 {dimension_numbers = #tpu.dot_dimension_numbers<[1], [0], [0], [1], [0, 0, 1, 1], [], []>} : vector<64x16xbf16>, vector<16x64xbf16>, vector<64x64xf32> -> vector<64x64xf32>
    %27 = vector.broadcast %2 : vector<1x64xf32> to vector<64x64xf32>
    %28 = arith.addf %26, %27 : vector<64x64xf32>
    %cst_12 = arith.constant 0.000000e+00 : f32
    %29 = vector.broadcast %cst_12 : f32 to vector<64x64xf32>
    %30 = arith.subf %29, %28 : vector<64x64xf32>
    %31 = math.exp %30 : vector<64x64xf32>
    %cst_13 = arith.constant 1.000000e+00 : f32
    %32 = vector.broadcast %cst_13 : f32 to vector<64x64xf32>
    %33 = arith.addf %32, %31 : vector<64x64xf32>
    %cst_14 = arith.constant 1.000000e+00 : f32
    %34 = vector.broadcast %cst_14 : f32 to vector<64x64xf32>
    %35 = arith.divf %34, %33 : vector<64x64xf32>
    %36 = arith.mulf %28, %35 : vector<64x64xf32>
    %cst_15 = arith.constant 0.000000e+00 : f32
    %37 = vector.broadcast %cst_15 : f32 to vector<10x10x64xf32>
    %c0_16 = arith.constant 0 : index
    %c0_17 = arith.constant 0 : index
    %c0_18 = arith.constant 0 : index
    %38 = vector.load %arg13[%c0_16, %c0_17, %c0_18] : memref<10x10x64xf32, #tpu.memory_space<vmem>>, vector<10x10x64xf32>
    tpu.vector_store %arg13[%c0_16, %c0_17, %c0_18], %37 {strides = array<i32>} : memref<10x10x64xf32, #tpu.memory_space<vmem>>, vector<10x10x64xf32>,
    %39 = vector.shape_cast %36 : vector<64x64xf32> to vector<8x8x64xf32>
    %c1 = arith.constant 1 : index
    %c1_19 = arith.constant 1 : index
    %c0_20 = arith.constant 0 : index
    %40 = vector.load %arg13[%c1, %c1_19, %c0_20] : memref<10x10x64xf32, #tpu.memory_space<vmem>>, vector<8x8x64xf32>
    tpu.vector_store %arg13[%c1, %c1_19, %c0_20], %39 {strides = array<i32>} : memref<10x10x64xf32, #tpu.memory_space<vmem>>, vector<8x8x64xf32>,
    %c0_21 = arith.constant 0 : index
    %c0_22 = arith.constant 0 : index
    %c0_23 = arith.constant 0 : index
    %41 = vector.load %arg13[%c0_21, %c0_22, %c0_23] : memref<10x10x64xf32, #tpu.memory_space<vmem>>, vector<10x10x64xf32>
    %c0_24 = arith.constant 0 : index
    %c0_25 = arith.constant 0 : index
    %c0_26 = arith.constant 0 : index
    %42 = vector.load %arg4[%c0_24, %c0_25, %c0_26] : memref<3x3x64xf32, #tpu.memory_space<vmem>>, vector<3x3x64xf32>
    %43 = vector.extract_strided_slice %41 {offsets = [0, 0, 0], sizes = [8, 8, 64], strides = [1, 1, 1]} : vector<10x10x64xf32> to vector<8x8x64xf32>
    %44 = vector.extract_strided_slice %42 {offsets = [0, 0, 0], sizes = [1, 1, 64], strides = [1, 1, 1]} : vector<3x3x64xf32> to vector<1x1x64xf32>
    %45 = vector.shape_cast %44 : vector<1x1x64xf32> to vector<64xf32>
    %46 = vector.shape_cast %45 : vector<64xf32> to vector<1x1x64xf32>
    %47 = vector.broadcast %46 : vector<1x1x64xf32> to vector<8x8x64xf32>
    %48 = arith.mulf %43, %47 : vector<8x8x64xf32>
    %49 = vector.extract_strided_slice %41 {offsets = [0, 1, 0], sizes = [8, 8, 64], strides = [1, 1, 1]} : vector<10x10x64xf32> to vector<8x8x64xf32>
    %50 = vector.extract_strided_slice %42 {offsets = [0, 1, 0], sizes = [1, 1, 64], strides = [1, 1, 1]} : vector<3x3x64xf32> to vector<1x1x64xf32>
    %51 = vector.shape_cast %50 : vector<1x1x64xf32> to vector<64xf32>
    %52 = vector.shape_cast %51 : vector<64xf32> to vector<1x1x64xf32>
    %53 = vector.broadcast %52 : vector<1x1x64xf32> to vector<8x8x64xf32>
    %54 = arith.mulf %49, %53 : vector<8x8x64xf32>
    %55 = arith.addf %48, %54 : vector<8x8x64xf32>
    %56 = vector.extract_strided_slice %41 {offsets = [0, 2, 0], sizes = [8, 8, 64], strides = [1, 1, 1]} : vector<10x10x64xf32> to vector<8x8x64xf32>
    %57 = vector.extract_strided_slice %42 {offsets = [0, 2, 0], sizes = [1, 1, 64], strides = [1, 1, 1]} : vector<3x3x64xf32> to vector<1x1x64xf32>
    %58 = vector.shape_cast %57 : vector<1x1x64xf32> to vector<64xf32>
    %59 = vector.shape_cast %58 : vector<64xf32> to vector<1x1x64xf32>
    %60 = vector.broadcast %59 : vector<1x1x64xf32> to vector<8x8x64xf32>
    %61 = arith.mulf %56, %60 : vector<8x8x64xf32>
    %62 = arith.addf %55, %61 : vector<8x8x64xf32>
    %63 = vector.extract_strided_slice %41 {offsets = [1, 0, 0], sizes = [8, 8, 64], strides = [1, 1, 1]} : vector<10x10x64xf32> to vector<8x8x64xf32>
    %64 = vector.extract_strided_slice %42 {offsets = [1, 0, 0], sizes = [1, 1, 64], strides = [1, 1, 1]} : vector<3x3x64xf32> to vector<1x1x64xf32>
    %65 = vector.shape_cast %64 : vector<1x1x64xf32> to vector<64xf32>
    %66 = vector.shape_cast %65 : vector<64xf32> to vector<1x1x64xf32>
    %67 = vector.broadcast %66 : vector<1x1x64xf32> to vector<8x8x64xf32>
    %68 = arith.mulf %63, %67 : vector<8x8x64xf32>
    %69 = arith.addf %62, %68 : vector<8x8x64xf32>
    %70 = vector.extract_strided_slice %41 {offsets = [1, 1, 0], sizes = [8, 8, 64], strides = [1, 1, 1]} : vector<10x10x64xf32> to vector<8x8x64xf32>
    %71 = vector.extract_strided_slice %42 {offsets = [1, 1, 0], sizes = [1, 1, 64], strides = [1, 1, 1]} : vector<3x3x64xf32> to vector<1x1x64xf32>
    %72 = vector.shape_cast %71 : vector<1x1x64xf32> to vector<64xf32>
    %73 = vector.shape_cast %72 : vector<64xf32> to vector<1x1x64xf32>
    %74 = vector.broadcast %73 : vector<1x1x64xf32> to vector<8x8x64xf32>
    %75 = arith.mulf %70, %74 : vector<8x8x64xf32>
    %76 = arith.addf %69, %75 : vector<8x8x64xf32>
    %77 = vector.extract_strided_slice %41 {offsets = [1, 2, 0], sizes = [8, 8, 64], strides = [1, 1, 1]} : vector<10x10x64xf32> to vector<8x8x64xf32>
    %78 = vector.extract_strided_slice %42 {offsets = [1, 2, 0], sizes = [1, 1, 64], strides = [1, 1, 1]} : vector<3x3x64xf32> to vector<1x1x64xf32>
    %79 = vector.shape_cast %78 : vector<1x1x64xf32> to vector<64xf32>
    %80 = vector.shape_cast %79 : vector<64xf32> to vector<1x1x64xf32>
    %81 = vector.broadcast %80 : vector<1x1x64xf32> to vector<8x8x64xf32>
    %82 = arith.mulf %77, %81 : vector<8x8x64xf32>
    %83 = arith.addf %76, %82 : vector<8x8x64xf32>
    %84 = vector.extract_strided_slice %41 {offsets = [2, 0, 0], sizes = [8, 8, 64], strides = [1, 1, 1]} : vector<10x10x64xf32> to vector<8x8x64xf32>
    %85 = vector.extract_strided_slice %42 {offsets = [2, 0, 0], sizes = [1, 1, 64], strides = [1, 1, 1]} : vector<3x3x64xf32> to vector<1x1x64xf32>
    %86 = vector.shape_cast %85 : vector<1x1x64xf32> to vector<64xf32>
    %87 = vector.shape_cast %86 : vector<64xf32> to vector<1x1x64xf32>
    %88 = vector.broadcast %87 : vector<1x1x64xf32> to vector<8x8x64xf32>
    %89 = arith.mulf %84, %88 : vector<8x8x64xf32>
    %90 = arith.addf %83, %89 : vector<8x8x64xf32>
    %91 = vector.extract_strided_slice %41 {offsets = [2, 1, 0], sizes = [8, 8, 64], strides = [1, 1, 1]} : vector<10x10x64xf32> to vector<8x8x64xf32>
    %92 = vector.extract_strided_slice %42 {offsets = [2, 1, 0], sizes = [1, 1, 64], strides = [1, 1, 1]} : vector<3x3x64xf32> to vector<1x1x64xf32>
    %93 = vector.shape_cast %92 : vector<1x1x64xf32> to vector<64xf32>
    %94 = vector.shape_cast %93 : vector<64xf32> to vector<1x1x64xf32>
    %95 = vector.broadcast %94 : vector<1x1x64xf32> to vector<8x8x64xf32>
    %96 = arith.mulf %91, %95 : vector<8x8x64xf32>
    %97 = arith.addf %90, %96 : vector<8x8x64xf32>
    %98 = vector.extract_strided_slice %41 {offsets = [2, 2, 0], sizes = [8, 8, 64], strides = [1, 1, 1]} : vector<10x10x64xf32> to vector<8x8x64xf32>
    %99 = vector.extract_strided_slice %42 {offsets = [2, 2, 0], sizes = [1, 1, 64], strides = [1, 1, 1]} : vector<3x3x64xf32> to vector<1x1x64xf32>
    %100 = vector.shape_cast %99 : vector<1x1x64xf32> to vector<64xf32>
    %101 = vector.shape_cast %100 : vector<64xf32> to vector<1x1x64xf32>
    %102 = vector.broadcast %101 : vector<1x1x64xf32> to vector<8x8x64xf32>
    %103 = arith.mulf %98, %102 : vector<8x8x64xf32>
    %104 = arith.addf %97, %103 : vector<8x8x64xf32>
    %105 = vector.shape_cast %3 : vector<1x64xf32> to vector<1x1x64xf32>
    %106 = vector.broadcast %105 : vector<1x1x64xf32> to vector<8x8x64xf32>
    %107 = arith.addf %104, %106 : vector<8x8x64xf32>
    %cst_27 = arith.constant 0.000000e+00 : f32
    %108 = vector.broadcast %cst_27 : f32 to vector<8x8x64xf32>
    %109 = arith.subf %108, %107 : vector<8x8x64xf32>
    %110 = math.exp %109 : vector<8x8x64xf32>
    %cst_28 = arith.constant 1.000000e+00 : f32
    %111 = vector.broadcast %cst_28 : f32 to vector<8x8x64xf32>
    %112 = arith.addf %111, %110 : vector<8x8x64xf32>
    %cst_29 = arith.constant 1.000000e+00 : f32
    %113 = vector.broadcast %cst_29 : f32 to vector<8x8x64xf32>
    %114 = arith.divf %113, %112 : vector<8x8x64xf32>
    %115 = arith.mulf %107, %114 : vector<8x8x64xf32>
    %116 = vector.shape_cast %115 : vector<8x8x64xf32> to vector<64x64xf32>
    %cst_30 = arith.constant dense<0.000000e+00> : vector<64xf32>
    %117 = vector.multi_reduction <add>, %116, %cst_30 [0] : vector<64x64xf32> to vector<64xf32>
    %118 = vector.shape_cast %117 : vector<64xf32> to vector<1x64xf32>
    %cst_31 = arith.constant 6.400000e+01 : f32
    %119 = vector.broadcast %cst_31 : f32 to vector<1x64xf32>
    %120 = arith.divf %118, %119 : vector<1x64xf32>
    %c0_32 = arith.constant 0 : index
    %c0_33 = arith.constant 0 : index
    %121 = vector.load %arg5[%c0_32, %c0_33] : memref<64x4xf32, #tpu.memory_space<vmem>>, vector<64x4xf32>
    %cst_34 = arith.constant dense<0.000000e+00> : vector<1x4xf32>
    %122 = tpu.matmul %120, %121, %cst_34 {dimension_numbers = #tpu.dot_dimension_numbers<[1], [0], [0], [1], [0, 0, 1, 1], [], []>} : vector<1x64xf32>, vector<64x4xf32>, vector<1x4xf32> -> vector<1x4xf32>
    %123 = arith.addf %122, %4 : vector<1x4xf32>
    %cst_35 = arith.constant 0.000000e+00 : f32
    %124 = vector.broadcast %cst_35 : f32 to vector<1x4xf32>
    %125 = arith.subf %124, %123 : vector<1x4xf32>
    %126 = math.exp %125 : vector<1x4xf32>
    %cst_36 = arith.constant 1.000000e+00 : f32
    %127 = vector.broadcast %cst_36 : f32 to vector<1x4xf32>
    %128 = arith.addf %127, %126 : vector<1x4xf32>
    %cst_37 = arith.constant 1.000000e+00 : f32
    %129 = vector.broadcast %cst_37 : f32 to vector<1x4xf32>
    %130 = arith.divf %129, %128 : vector<1x4xf32>
    %131 = arith.mulf %123, %130 : vector<1x4xf32>
    %c0_38 = arith.constant 0 : index
    %c0_39 = arith.constant 0 : index
    %132 = vector.load %arg6[%c0_38, %c0_39] : memref<4x64xf32, #tpu.memory_space<vmem>>, vector<4x64xf32>
    %cst_40 = arith.constant dense<0.000000e+00> : vector<1x64xf32>
    %133 = tpu.matmul %131, %132, %cst_40 {dimension_numbers = #tpu.dot_dimension_numbers<[1], [0], [0], [1], [0, 0, 1, 1], [], []>} : vector<1x4xf32>, vector<4x64xf32>, vector<1x64xf32> -> vector<1x64xf32>
    %134 = arith.addf %133, %5 : vector<1x64xf32>
    %cst_41 = arith.constant 0.000000e+00 : f32
    %135 = vector.broadcast %cst_41 : f32 to vector<1x64xf32>
    %136 = arith.subf %135, %134 : vector<1x64xf32>
    %137 = math.exp %136 : vector<1x64xf32>
    %cst_42 = arith.constant 1.000000e+00 : f32
    %138 = vector.broadcast %cst_42 : f32 to vector<1x64xf32>
    %139 = arith.addf %138, %137 : vector<1x64xf32>
    %cst_43 = arith.constant 1.000000e+00 : f32
    %140 = vector.broadcast %cst_43 : f32 to vector<1x64xf32>
    %141 = arith.divf %140, %139 : vector<1x64xf32>
    %142 = vector.broadcast %141 : vector<1x64xf32> to vector<64x64xf32>
    %143 = arith.mulf %116, %142 : vector<64x64xf32>
    %144 = arith.truncf %143 : vector<64x64xf32> to vector<64x64xbf16>
    %c0_44 = arith.constant 0 : index
    %c0_45 = arith.constant 0 : index
    %145 = vector.load %arg7[%c0_44, %c0_45] : memref<64x16xbf16, #tpu.memory_space<vmem>>, vector<64x16xbf16>
    %cst_46 = arith.constant dense<0.000000e+00> : vector<64x16xf32>
    %146 = tpu.matmul %144, %145, %cst_46 {dimension_numbers = #tpu.dot_dimension_numbers<[1], [0], [0], [1], [0, 0, 1, 1], [], []>} : vector<64x64xbf16>, vector<64x16xbf16>, vector<64x16xf32> -> vector<64x16xf32>
    %147 = vector.broadcast %6 : vector<1x16xf32> to vector<64x16xf32>
    %148 = arith.addf %146, %147 : vector<64x16xf32>
    %149 = arith.addf %148, %23 : vector<64x16xf32>
    %150 = arith.truncf %149 : vector<64x16xf32> to vector<64x16xbf16>
    %c0_47 = arith.constant 0 : index
    %c0_48 = arith.constant 0 : index
    %151 = vector.load %arg8[%c0_47, %c0_48] : memref<16x64xbf16, #tpu.memory_space<vmem>>, vector<16x64xbf16>
    %cst_49 = arith.constant dense<0.000000e+00> : vector<64x64xf32>
    %152 = tpu.matmul %150, %151, %cst_49 {dimension_numbers = #tpu.dot_dimension_numbers<[1], [0], [0], [1], [0, 0, 1, 1], [], []>} : vector<64x16xbf16>, vector<16x64xbf16>, vector<64x64xf32> -> vector<64x64xf32>
    %153 = vector.broadcast %7 : vector<1x64xf32> to vector<64x64xf32>
    %154 = arith.addf %152, %153 : vector<64x64xf32>
    %cst_50 = arith.constant 0.000000e+00 : f32
    %155 = vector.broadcast %cst_50 : f32 to vector<64x64xf32>
    %156 = arith.subf %155, %154 : vector<64x64xf32>
    %157 = math.exp %156 : vector<64x64xf32>
    %cst_51 = arith.constant 1.000000e+00 : f32
    %158 = vector.broadcast %cst_51 : f32 to vector<64x64xf32>
    %159 = arith.addf %158, %157 : vector<64x64xf32>
    %cst_52 = arith.constant 1.000000e+00 : f32
    %160 = vector.broadcast %cst_52 : f32 to vector<64x64xf32>
    %161 = arith.divf %160, %159 : vector<64x64xf32>
    %162 = arith.mulf %154, %161 : vector<64x64xf32>
    %cst_53 = arith.constant dense<0.000000e+00> : vector<64xf32>
    %163 = vector.multi_reduction <add>, %162, %cst_53 [0] : vector<64x64xf32> to vector<64xf32>
    %164 = vector.shape_cast %163 : vector<64xf32> to vector<1x64xf32>
    %cst_54 = arith.constant 6.400000e+01 : f32
    %165 = vector.broadcast %cst_54 : f32 to vector<1x64xf32>
    %166 = arith.divf %164, %165 : vector<1x64xf32>
    %c0_55 = arith.constant 0 : index
    %c0_56 = arith.constant 0 : index
    %167 = vector.load %arg9[%c0_55, %c0_56] : memref<64x32xf32, #tpu.memory_space<vmem>>, vector<64x32xf32>
    %cst_57 = arith.constant dense<0.000000e+00> : vector<1x32xf32>
    %168 = tpu.matmul %166, %167, %cst_57 {dimension_numbers = #tpu.dot_dimension_numbers<[1], [0], [0], [1], [0, 0, 1, 1], [], []>} : vector<1x64xf32>, vector<64x32xf32>, vector<1x32xf32> -> vector<1x32xf32>
    %169 = arith.addf %168, %8 : vector<1x32xf32>
    %cst_58 = arith.constant 0.000000e+00 : f32
    %170 = vector.broadcast %cst_58 : f32 to vector<1x32xf32>
    %171 = arith.maximumf %169, %170 : vector<1x32xf32>
    %c0_59 = arith.constant 0 : index
    %c0_60 = arith.constant 0 : index
    %172 = vector.load %arg10[%c0_59, %c0_60] : memref<32x8xf32, #tpu.memory_space<vmem>>, vector<32x8xf32>
    %cst_61 = arith.constant dense<0.000000e+00> : vector<1x8xf32>
    %173 = tpu.matmul %171, %172, %cst_61 {dimension_numbers = #tpu.dot_dimension_numbers<[1], [0], [0], [1], [0, 0, 1, 1], [], []>} : vector<1x32xf32>, vector<32x8xf32>, vector<1x8xf32> -> vector<1x8xf32>
    %174 = arith.addf %173, %9 : vector<1x8xf32>
    %c0_62 = arith.constant 0 : index
    %c0_63 = arith.constant 0 : index
    %c0_64 = arith.constant 0 : index
    %175 = vector.load %arg12[%c0_62, %c0_63, %c0_64] : memref<1x1x8xf32, #tpu.memory_space<vmem>>, vector<1x1x8xf32>
    %176 = vector.shape_cast %175 : vector<1x1x8xf32> to vector<1x8xf32>
    %177 = vector.shape_cast %174 : vector<1x8xf32> to vector<1x1x8xf32>
    tpu.vector_store %arg12[%c0_62, %c0_63, %c0_64], %177 {strides = array<i32>} : memref<1x1x8xf32, #tpu.memory_space<vmem>>, vector<1x1x8xf32>,
    return
  }
  func.func @transform_0(%arg0: i32) -> (i32, i32, i32) {
    %c0_i32 = arith.constant 0 : i32
    %c0_i32_0 = arith.constant 0 : i32
    %c0_i32_1 = arith.constant 0 : i32
    return %arg0, %c0_i32, %c0_i32_0 : i32, i32, i32
  }
  func.func @transform_1(%arg0: i32) -> (i32, i32) {
    %c0_i32 = arith.constant 0 : i32
    %c0_i32_0 = arith.constant 0 : i32
    %c0_i32_1 = arith.constant 0 : i32
    return %c0_i32, %c0_i32_0 : i32, i32
  }
  func.func @transform_2(%arg0: i32) -> (i32, i32) {
    %c0_i32 = arith.constant 0 : i32
    %c0_i32_0 = arith.constant 0 : i32
    %c0_i32_1 = arith.constant 0 : i32
    return %c0_i32, %c0_i32_0 : i32, i32
  }
  func.func @transform_3(%arg0: i32) -> (i32, i32, i32) {
    %c0_i32 = arith.constant 0 : i32
    %c0_i32_0 = arith.constant 0 : i32
    %c0_i32_1 = arith.constant 0 : i32
    %c0_i32_2 = arith.constant 0 : i32
    return %c0_i32, %c0_i32_0, %c0_i32_1 : i32, i32, i32
  }
  func.func @transform_4(%arg0: i32) -> (i32, i32) {
    %c0_i32 = arith.constant 0 : i32
    %c0_i32_0 = arith.constant 0 : i32
    %c0_i32_1 = arith.constant 0 : i32
    return %c0_i32, %c0_i32_0 : i32, i32
  }
  func.func @transform_5(%arg0: i32) -> (i32, i32) {
    %c0_i32 = arith.constant 0 : i32
    %c0_i32_0 = arith.constant 0 : i32
    %c0_i32_1 = arith.constant 0 : i32
    return %c0_i32, %c0_i32_0 : i32, i32
  }
  func.func @transform_6(%arg0: i32) -> (i32, i32) {
    %c0_i32 = arith.constant 0 : i32
    %c0_i32_0 = arith.constant 0 : i32
    %c0_i32_1 = arith.constant 0 : i32
    return %c0_i32, %c0_i32_0 : i32, i32
  }
  func.func @transform_7(%arg0: i32) -> (i32, i32) {
    %c0_i32 = arith.constant 0 : i32
    %c0_i32_0 = arith.constant 0 : i32
    %c0_i32_1 = arith.constant 0 : i32
    return %c0_i32, %c0_i32_0 : i32, i32
  }
  func.func @transform_8(%arg0: i32) -> (i32, i32) {
    %c0_i32 = arith.constant 0 : i32
    %c0_i32_0 = arith.constant 0 : i32
    %c0_i32_1 = arith.constant 0 : i32
    return %c0_i32, %c0_i32_0 : i32, i32
  }
  func.func @transform_9(%arg0: i32) -> (i32, i32) {
    %c0_i32 = arith.constant 0 : i32
    %c0_i32_0 = arith.constant 0 : i32
    %c0_i32_1 = arith.constant 0 : i32
    return %c0_i32, %c0_i32_0 : i32, i32
  }
  func.func @transform_10(%arg0: i32) -> (i32, i32) {
    %c0_i32 = arith.constant 0 : i32
    %c0_i32_0 = arith.constant 0 : i32
    %c0_i32_1 = arith.constant 0 : i32
    return %c0_i32, %c0_i32_0 : i32, i32
  }
  func.func @transform_11(%arg0: i32) -> (i32, i32, i32) {
    %c0_i32 = arith.constant 0 : i32
    %c0_i32_0 = arith.constant 0 : i32
    %c0_i32_1 = arith.constant 0 : i32
    return %arg0, %c0_i32, %c0_i32_0 : i32, i32, i32
  }
}

</mosaic_0001>

<bundles_post_ra>
// kernel: efficientnet_spec_forward.1
= control target key start
LH: loop header
LB: loop body
LE: loop exit
PB: predicated region body
PF: predicated region fallthrough
CT: control target
= control target key end

     0   :  { %s3495_s0 = inlined_call_operand.vmem [shape: bf16[2,64,32], index: 0, kind: input, shape index: {}]   ;;  %s3496_s1 = inlined_call_operand.vmem [shape: bf16[32,16], index: 1, kind: input, shape index: {}]   ;;  %s3497_s2 = inlined_call_operand.vmem [shape: bf16[16,64], index: 2, kind: input, shape index: {}]   ;;  %s3498_s3 = inlined_call_operand.vmem [shape: f32[3,3,64], index: 3, kind: input, shape index: {}]   ;;  %s3499_s4 = inlined_call_operand.vmem [shape: f32[64,4], index: 4, kind: input, shape index: {}]   ;;  %s3500_s5 = inlined_call_operand.vmem [shape: f32[4,64], index: 5, kind: input, shape index: {}]   ;;  %s3501_s6 = inlined_call_operand.vmem [shape: bf16[64,16], index: 6, kind: input, shape index: {}]   ;;  %s3502_s7 = inlined_call_operand.vmem [shape: bf16[16,64], index: 7, kind: input, shape index: {}]   ;;  %s3503_s8 = inlined_call_operand.vmem [shape: f32[64,32], index: 8, kind: input, shape index: {}]   ;;  %s3504_s9 = inlined_call_operand.vmem [shape: f32[32,8], index: 9, kind: input, shape index: {}]   ;;  %s3505_s10 = inlined_call_operand.vmem [shape: f32[9,128], index: 10, kind: input, shape index: {}]   ;;  %s3506_s11 = inlined_call_operand.hbm [shape: f32[2,1,8], index: 11, kind: output, shape index: {}]  }
   0x1   :  { %3525 = sst [smem:[#allocation21_spill]] %s3495_s0 }
   0x2   :  { %16 = vsyncpa [#allocation4], 0 }
   0x3   :  { %18 = vsyncpa [#allocation4 + $0x1], 0  ;;  %s2600_s17 = smov 0   ;;  %s2602_s18 = smov 0  }
   0x4   :  { %s2604_s19 = smov 0   ;;  %s2606_s20 = smov 0  }
   0x5 LB: > { %s2621_s21 = sadd.s32 4294967295, %s2535_s20   ;;  %s2091_s22 = sadd.s32 4294967294, %s2535_s20   ;;  %s2535_s20 = sphi %s2606_s20, %s3573_s20   ;;  %s2531_s19 = sphi %s2604_s19, %s3572_s19   ;;  %s2527_s18 = sphi %s2602_s18, %s3571_s18   ;;  %s2523_s17 = sphi %s2600_s17, %s3570_s17  }
   0x6   : > { %s2625_s23 = sadd.s32 1, %s2535_s20   ;;  %s267_s24 = sadd.s32 1, %s2531_s19 }
   0x7   : > { %s264_s25 = ssub.s32 %s2535_s20, %s2625_s23  ;;  %p277_p0 = scmp.ne.s32.totalorder %s2531_s19, %s2527_s18 }
   0x8   : > { %p265_p1 = scmp.eq.s32.totalorder %s264_s25, 0  ;;  %p278_p2 = scmp.eq.s32.totalorder %s2621_s21, 1 }
   0x9   : > { %p283_p3 = scmp.ne.s32.totalorder %s2527_s18, %s2523_s17  ;;  %p284_p4 = scmp.eq.s32.totalorder %s2091_s22, 1 }
   0xa   : > { %s2636_s26 = scalar_select %p265_p1, %s2531_s19, %s267_s24  }
   0xb   : > { %p2638_p5 = por %p278_p2, %p277_p0  ;;  %p2642_p6 = por %p284_p4, %p283_p3 }
   0xc   : > { %p2094_p7 = scmp.ge.s32.totalorder %s2535_s20, 1  ;;  %p340_p8 = scmp.lt.s32.totalorder %s2535_s20, 3 }
   0xe   : > { %p341_p9 = pnand %p2094_p7, %p340_p8 }
  0x10   : > { %344 = sbr.rel (%p341_p9) target bundleno = 1997 (0x7cd), region = 64 }
  0x15   : > { %v2326_v0 = vld [vmem:[%s3496_s1 + $0x8] sm:$0xff]   ;;  %p379_p10 = scmp.lt.s32.totalorder %s2621_s21, 1  ;;  %v2327_v1 = vld [vmem:[%s3496_s1] sm:$0xff]   ;;  %vm435_vm0 = vcmask 261120   ;;  %s3528_s0 = sld [smem:[#allocation21_spill]]  ;;  %v399_v7 = vlaneseq  ;;  %vm585_vm1 = vcmask 130048  }
  0x16   : > { %2183 = vmatprep.subr.bf16.mxu0 %v2326_v0  ;;  %v2332_v6 = vld [vmem:[%s3497_s2] sm:$0xff]   ;;  %vm719_vm2 = vcmask 523264   ;;  %vm721_vm3 = vcmask 517120   ;;  %vm2538_vm4 = vmmov 0   ;;  %vm821_vm5 = vcmask 1046528   ;;  %s377_s13 = sand.u32 1, %s2527_s18  }
  0x17   : > { %s380_s14 = scalar_select %p379_p10, %s2621_s21, 1  ;;  %2184 = vmatpush3.bf16.msra.mxu0 %v2326_v0  ;;  %2195 = vmatprep.subr.bf16.mxu1 %v2332_v6  ;;  %v2666_v8 = vshrl.u32 %v399_v7, 7  ;;  %v2674_v10 = vld [vmem:[%s3505_s10] sm:$0xff]  ;;  %vm898_vm6 = vcmask 1045504   ;;  %vm1472_vm7 = vcmask 1043456   ;;  %vm1468_vm8 = vcmask 31744  }
  0x18   : > { %2185 = vmatprep.subr.bf16.mxu0 %v2327_v1  ;;  %2196 = vmatpush3.bf16.msra.mxu1 %v2332_v6  ;;  %s2130_s16 = sshll.u32 %s2621_s21, 4  ;;  %s378_s22 = scalar_lea.vmem [#allocation3], %s377_s13  ;;  %vm2021_vm9 = vcmask 57344  }
  0x19   : > { %s2133_s15 = sshll.u32 %s380_s14, 5  ;;  %3529 = vst [vmem:[#allocation6_spill] sm:$0xff] %v2666_v8  ;;  %v2669_v9 = vsub.s32 0, %v2666_v8  ;;  %s3460_s30 = scalar_lea.hbm %s3506_s11, %s2130_s16 }
  0x1a   : > { %s2024_s12 = scalar_lea.sflag [#allocation4], %s377_s13  ;;  %s2539_s21 = smov [#allocation3]  }
  0x1b   : > { %s383_s24 = scalar_lea.vmem %s3528_s0, %s2133_s15  ;;  %2186 = vmatpush3.bf16.msra.mxu0 %v2327_v1  ;;  %3530 = vst [vmem:[#allocation7_spill] sm:$0xff] %v2669_v9  ;;  %v402_v11 = vrot.slane %v2674_v10, %v2669_v9  ;;  %s2479_s14 = sshll.u32 %s2539_s21, 4  ;;  %s2480_s14 = int_to_ptr.vmem [resolvable:$false] %s2479_s14 }
  0x1c   : > { %v2328_v2 = vld [vmem:[%s383_s24] sm:$0xff]   ;;  %v2329_v3 = vld [vmem:[%s383_s24 + $0x8] sm:$0xff]   ;;  %v2330_v4 = vld [vmem:[%s383_s24 + $0x10] sm:$0xff]   ;;  %s2481_s15 = scalar_lea.vmem %s2480_s14, 32 }
  0x1d   : > { %2187 = vmatprep.mubr.msk.bf16.mxu0 %vm435_vm0, %v2328_v2  ;;  %v2331_v5 = vld [vmem:[%s383_s24 + $0x18] sm:$0xff]   ;;  %s2036_s24 = sshll.u32 %s378_s22, 4  ;;  %s2037_s24 = int_to_ptr.vmem [resolvable:$true] %s2036_s24 }
  0x1e   : > { %2188 = vmatmul.mubr.msk.bf16.vlgmr.msra.gmra.mxu0 %vm435_vm0, %v2329_v3  ;;  %s2475_s0 = scalar_lea.vmem %s2037_s24, 16  ;;  %p2482_p0 = scmp.lt.s32.totalorder %s2037_s24, %s2480_s14 }
  0x1f   : > { %2191 = vmatprep.mubr.msk.bf16.mxu0 %vm435_vm0, %v2330_v4  ;;  %p2476_p11 = scmp.ne.s32.totalorder %s2037_s24, %s2475_s0  ;;  %p2483_p1 = scmp.lt.s32.totalorder %s2481_s15, %s2475_s0 }
  0x21   : > { %p2477_p12 = pnand %p2476_p11, %p2638_p5  ;;  %p2484_p2 = por %p2483_p1, %p2482_p0 }
  0x23   : > { %p2478_p13 = pneg %p2477_p12 }
  0x25   : > { %p2485_p3 = pnand %p2484_p2, %p2478_p13 }
  0x26   : > { %2192 = vmatmul.mubr.msk.bf16.gmra.mxu0 %vm435_vm0, %v2331_v5 }
  0xde   : > { %v2189_v12 = vpop.f32.mrf.mxu0 }
  0xdf   : > { %v2678_v13 = vadd.f32 %v2189_v12, %v402_v11 }
  0xe0   : > { %v482_v14 = vpop.f32.mrf.mxu0 }
  0xe1   : > { %v515_v15 = vsub.f32 0.0, %v2678_v13  ;;  %v2681_v16 = vadd.f32 %v482_v14, %v402_v11 }
  0xe2   : > { %v2190_v17 = vpop.f32.mrf.mxu0 }
  0xe3   : > { %v525_v18 = vmul.f32 1.442695, %v515_v15  ;;  %v513_v19 = vsub.f32 0.0, %v2681_v16  ;;  %v494_v20 = vadd.f32 %v2190_v17, %v402_v11 }
  0xe4   : > { %v485_v21 = vpop.f32.mrf.mxu0 }
  0xe5   : > { %v521_v22 = vmul.f32 1.442695, %v513_v19  ;;  %v516_v23 = vsub.f32 0.0, %v494_v20  ;;  %v486_v24 = vadd.f32 %v485_v21, %v402_v11  ;;  %2338 = vpow2.f32 %v525_v18  ;;  %v1380_v21 = vld [vmem:[%s3499_s4 + $0x30] sm:$0xff] }
  0xe6   : > { %v2193_v25 = vpop.f32.mrf.mxu0  ;;  %v3507_v19 = vmov 0.0  }
  0xe7   : > { %2340 = vpow2.f32 %v521_v22  ;;  %v527_v26 = vmul.f32 1.442695, %v516_v23  ;;  %v514_v27 = vsub.f32 0.0, %v486_v24  ;;  %v2684_v28 = vadd.f32 %v2193_v25, %v402_v11  ;;  %722 = vst.msk [vmem:[#allocation2 + $0x8] sm:$0x3] %vm721_vm3, %v3507_v19  ;;  %2205 = vmatprep.subr.mxu1 %v3507_v19  ;;  %2224 = vmatprep.subr.mxu0 %v3507_v19  ;;  %v1379_v22 = vld [vmem:[%s3499_s4 + $0x28] sm:$0xff] }
  0xe8   : > { %v498_v29 = vpop.f32.mrf.mxu0  ;;  %727 = vst.msk [vmem:[#allocation2 + $0x30] sm:$0xff] %vm719_vm2, %v3507_v19  ;;  %720 = vst.msk [vmem:[#allocation2] sm:$0xff] %vm719_vm2, %v3507_v19  ;;  %2226 = vmatprep.mubr.msk.f32.mxu0 %vm2538_vm4, %v3507_v19  ;;  %v1378_v23 = vld [vmem:[%s3499_s4 + $0x20] sm:$0xff]  ;;  %v1376_v25 = vld [vmem:[%s3499_s4 + $0x10] sm:$0xff] }
  0xe9   : > { %2342 = vpow2.f32 %v527_v26  ;;  %v523_v30 = vmul.f32 1.442695, %v514_v27  ;;  %v519_v31 = vsub.f32 0.0, %v2684_v28  ;;  %v499_v32 = vadd.f32 %v498_v29, %v402_v11  ;;  %728 = vst.msk [vmem:[#allocation2 + $0x38] sm:$0x3] %vm721_vm3, %v3507_v19  ;;  %v1375_v26 = vld [vmem:[%s3499_s4 + $0x8] sm:$0xff] }
  0xea   : > { %v2194_v33 = vpop.f32.mrf.mxu0  ;;  %740 = vst.msk [vmem:[#allocation2 + $0x98] sm:$0x3] %vm721_vm3, %v3507_v19  ;;  %724 = vst.msk [vmem:[#allocation2 + $0x18] sm:$0x3] %vm721_vm3, %v3507_v19  ;;  %v1374_v27 = vld [vmem:[%s3499_s4] sm:$0xff] }
  0xeb   : > { %2344 = vpow2.f32 %v523_v30  ;;  %v533_v34 = vmul.f32 1.442695, %v519_v31  ;;  %v517_v35 = vsub.f32 0.0, %v499_v32  ;;  %v510_v36 = vadd.f32 %v2194_v33, %v402_v11  ;;  %723 = vst.msk [vmem:[#allocation2 + $0x10] sm:$0xff] %vm719_vm2, %v3507_v19  ;;  %725 = vst.msk [vmem:[#allocation2 + $0x20] sm:$0xff] %vm719_vm2, %v3507_v19 }
  0xec   : > { %v501_v37 = vpop.f32.mrf.mxu0  ;;  %726 = vst.msk [vmem:[#allocation2 + $0x28] sm:$0x3] %vm721_vm3, %v3507_v19  ;;  %730 = vst.msk [vmem:[#allocation2 + $0x48] sm:$0x3] %vm721_vm3, %v3507_v19 }
  0xed   : > { %v529_v38 = vmul.f32 1.442695, %v517_v35  ;;  %v520_v39 = vsub.f32 0.0, %v510_v36  ;;  %v502_v40 = vadd.f32 %v501_v37, %v402_v11  ;;  %2346 = vpow2.f32 %v533_v34  ;;  %729 = vst.msk [vmem:[#allocation2 + $0x40] sm:$0xff] %vm719_vm2, %v3507_v19  ;;  %731 = vst.msk [vmem:[#allocation2 + $0x50] sm:$0xff] %vm719_vm2, %v3507_v19 }
  0xee   : > { %732 = vst.msk [vmem:[#allocation2 + $0x58] sm:$0x3] %vm721_vm3, %v3507_v19  ;;  %734 = vst.msk [vmem:[#allocation2 + $0x68] sm:$0x3] %vm721_vm3, %v3507_v19 }
  0xef   : > { %2348 = vpow2.f32 %v529_v38  ;;  %v535_v41 = vmul.f32 1.442695, %v520_v39  ;;  %v518_v42 = vsub.f32 0.0, %v502_v40  ;;  %733 = vst.msk [vmem:[#allocation2 + $0x60] sm:$0xff] %vm719_vm2, %v3507_v19  ;;  %735 = vst.msk [vmem:[#allocation2 + $0x70] sm:$0xff] %vm719_vm2, %v3507_v19 }
  0xf0   : > { %736 = vst.msk [vmem:[#allocation2 + $0x78] sm:$0x3] %vm721_vm3, %v3507_v19  ;;  %738 = vst.msk [vmem:[#allocation2 + $0x88] sm:$0x3] %vm721_vm3, %v3507_v19 }
  0xf1   : > { %2350 = vpow2.f32 %v535_v41  ;;  %v531_v43 = vmul.f32 1.442695, %v518_v42  ;;  %737 = vst.msk [vmem:[#allocation2 + $0x80] sm:$0xff] %vm719_vm2, %v3507_v19  ;;  %739 = vst.msk [vmem:[#allocation2 + $0x90] sm:$0xff] %vm719_vm2, %v3507_v19 }
  0xf2   : > { %v2339_v44 = vpop.eup %2338 }
  0xf3   : > { %2352 = vpow2.f32 %v531_v43  ;;  %v539_v48 = vadd.f32 1.0, %v2339_v44 }
  0xf4   : > { %v2341_v45 = vpop.eup %2340 }
  0xf5   : > { %v537_v46 = vadd.f32 1.0, %v2341_v45 }
  0xf6   : > { %v2343_v47 = vpop.eup %2342 }
  0xf7   : > { %v540_v49 = vadd.f32 1.0, %v2343_v47  ;;  %2354 = vrcp.f32 %v537_v46 }
  0xf8   : > { %v2345_v50 = vpop.eup %2344 }
  0xf9   : > { %2356 = vrcp.f32 %v540_v49  ;;  %v538_v51 = vadd.f32 1.0, %v2345_v50 }
  0xfa   : > { %2358 = vrcp.f32 %v539_v48  ;;  %v2347_v52 = vpop.eup %2346 }
  0xfb   : > { %2360 = vrcp.f32 %v538_v51  ;;  %v543_v56 = vadd.f32 1.0, %v2347_v52 }
  0xfc   : > { %v2349_v53 = vpop.eup %2348 }
  0xfd   : > { %v541_v54 = vadd.f32 1.0, %v2349_v53 }
  0xfe   : > { %v2351_v55 = vpop.eup %2350 }
  0xff   : > { %v544_v57 = vadd.f32 1.0, %v2351_v55  ;;  %2362 = vrcp.f32 %v541_v54 }
 0x100   : > { %v2353_v58 = vpop.eup %2352 }
 0x101   : > { %2364 = vrcp.f32 %v544_v57  ;;  %v542_v59 = vadd.f32 1.0, %v2353_v58 }
 0x102   : > { %2366 = vrcp.f32 %v543_v56 }
 0x103   : > { %2368 = vrcp.f32 %v542_v59 }
 0x104   : > { %v2355_v60 = vpop.eup %2354 }
 0x105   : > { %v2690_v1 = vmul.f32 %v2355_v60, %v2681_v16 }
 0x106   : > { %v2357_v61 = vpop.eup %2356 }
 0x107   : > { %v2359_v62 = vpop.eup %2358  ;;  %v2687_v0 = vmul.f32 %v2357_v61, %v494_v20  ;;  %3532 = vst [vmem:[#allocation9_spill] sm:$0xff] %v2690_v1  ;;  %v1381_v20 = vld [vmem:[%s3499_s4 + $0x38] sm:$0xff] }
 0x108   : > { %v2361_v63 = vpop.eup %2360  ;;  %v2695_v3 = vmul.f32 %v2359_v62, %v2678_v13 }
 0x109   : > { %3531 = vst [vmem:[#allocation8_spill] sm:$0xff] %v2687_v0  ;;  %v2692_v2 = vmul.f32 %v2361_v63, %v486_v24  ;;  %v1377_v24 = vld [vmem:[%s3499_s4 + $0x18] sm:$0xff] }
 0x10a   : > { %3534 = vst [vmem:[#allocation11_spill] sm:$0xff] %v2695_v3  ;;  %v570_v5 = vpack.c.bf16 %v2687_v0, %v2695_v3 }
 0x10b   : > { %3533 = vst [vmem:[#allocation10_spill] sm:$0xff] %v2692_v2  ;;  %v569_v4 = vpack.c.bf16 %v2692_v2, %v2690_v1 }
 0x10c   : > { %v2363_v6 = vpop.eup %2362 }
 0x10d   : > { %2197 = vmatprep.mubr.msk.bf16.mxu1 %vm585_vm1, %v569_v4  ;;  %v2705_v15 = vmul.f32 %v2363_v6, %v499_v32  ;;  %v770_v4 = vld [vmem:[%s3498_s3] sm:$0x7] }
 0x10e   : > { %v2365_v7 = vpop.eup %2364  ;;  %2198 = vmatmul.mubr.msk.bf16.vlgmr.msra.gmra.mxu1 %vm585_vm1, %v570_v5 }
 0x10f   : > { %v2367_v11 = vpop.eup %2366  ;;  %v2703_v14 = vmul.f32 %v2365_v7, %v510_v36  ;;  %3536 = vst [vmem:[#allocation13_spill] sm:$0xff] %v2705_v15  ;;  %2206 = vmatpush3.msra.mxu1 %v1381_v20 }
 0x110   : > { %v2369_v12 = vpop.eup %2368  ;;  %v2710_v16 = vmul.f32 %v2367_v11, %v2684_v28  ;;  %2207 = vmatprep.subr.mxu1 %v3507_v19  ;;  %v2796_v28 = vsub.s32 1, %v2666_v8 }
 0x111   : > { %3535 = vst [vmem:[#allocation12_spill] sm:$0xff] %v2703_v14  ;;  %v2707_v13 = vmul.f32 %v2369_v12, %v502_v40  ;;  %2208 = vmatpush3.msra.mxu1 %v1380_v21  ;;  %v2831_v12 = vsub.s32 2, %v2666_v8  ;;  %v751_v21 = vld [vmem:[#allocation2 + $0x8] sm:$0x3] }
 0x112   : > { %3538 = vst [vmem:[#allocation15_spill] sm:$0xff] %v2710_v16  ;;  %v572_v18 = vpack.c.bf16 %v2703_v14, %v2710_v16  ;;  %2209 = vmatprep.subr.mxu1 %v3507_v19  ;;  %v578_v29 = vrot.slane %v2674_v10, %v2796_v28  ;;  %v2828_v11 = vrot.slane %v770_v4, %v2796_v28 }
 0x113   : > { %3537 = vst [vmem:[#allocation14_spill] sm:$0xff] %v2707_v13  ;;  %v571_v17 = vpack.c.bf16 %v2707_v13, %v2705_v15  ;;  %2210 = vmatpush3.msra.mxu1 %v1379_v22 }
 0x114   : > { %2211 = vmatprep.subr.mxu1 %v3507_v19 }
 0x115   : > { %2201 = vmatprep.mubr.msk.bf16.mxu1 %vm585_vm1, %v571_v17  ;;  %2212 = vmatpush3.msra.mxu1 %v1378_v23 }
 0x116   : > { %2202 = vmatmul.mubr.msk.bf16.gmra.mxu1 %vm585_vm1, %v572_v18  ;;  %2213 = vmatprep.subr.mxu1 %v3507_v19  ;;  %v750_v18 = vld [vmem:[#allocation2] sm:$0xff] }
 0x117   : > { %2221 = vmatprep.mubr.msk.f32.mxu1 %vm2538_vm4, %v3507_v19  ;;  %2214 = vmatpush3.msra.mxu1 %v1377_v24  ;;  %v789_v24 = vmul.f32 %v2828_v11, %v750_v18 }
 0x118   : > { %2215 = vmatprep.subr.mxu1 %v3507_v19 }
 0x119   : > { %2216 = vmatpush3.msra.mxu1 %v1376_v25  ;;  %v2835_v25 = vrot.slane %v770_v4, %v2831_v12 }
 0x11a   : > { %2217 = vmatprep.subr.mxu1 %v3507_v19 }
 0x11b   : > { %2218 = vmatpush3.msra.mxu1 %v1375_v26 }
 0x11c   : > { %2219 = vmatprep.subr.mxu1 %v3507_v19 }
 0x11d   : > { %2220 = vmatpush3.msra.mxu1 %v1374_v27  ;;  %v790_v27 = vmul.f32 %v2828_v11, %v751_v21 }
 0x1ce   : > { %v2199_v30 = vpop.f32.mrf.mxu1 }
 0x1cf   : > { %v2800_v31 = vadd.f32 %v2199_v30, %v578_v29 }
 0x1d0   : > { %v632_v32 = vpop.f32.mrf.mxu1 }
 0x1d1   : > { %v665_v33 = vsub.f32 0.0, %v2800_v31  ;;  %v2803_v34 = vadd.f32 %v632_v32, %v578_v29  ;;  %v2839_v32 = vrot.slane %v770_v4, %v2669_v9 }
 0x1d2   : > { %v2200_v35 = vpop.f32.mrf.mxu1 }
 0x1d3   : > { %v675_v36 = vmul.f32 1.442695, %v665_v33  ;;  %v663_v37 = vsub.f32 0.0, %v2803_v34  ;;  %v2806_v38 = vadd.f32 %v2200_v35, %v578_v29  ;;  %v822_v33 = vrot.slane %v789_v24, 1  ;;  %v772_v35 = vld [vmem:[%s3498_s3 + $0x8] sm:$0x7] }
 0x1d4   : > { %v635_v39 = vpop.f32.mrf.mxu1 }
 0x1d5   : > { %2370 = vpow2.f32 %v675_v36  ;;  %v671_v40 = vmul.f32 1.442695, %v663_v37  ;;  %v666_v41 = vsub.f32 0.0, %v2806_v38  ;;  %v2809_v42 = vadd.f32 %v635_v39, %v578_v29 }
 0x1d6   : > { %v2203_v43 = vpop.f32.mrf.mxu1  ;;  %v823_v36 = vrot.slane %v790_v27, 1  ;;  %v866_v37 = vmul.f32 %v2835_v25, %v750_v18  ;;  %v867_v39 = vmul.f32 %v2835_v25, %v751_v21  ;;  %v2876_v27 = vrot.slane %v772_v35, %v2669_v9 }
 0x1d7   : > { %2372 = vpow2.f32 %v671_v40  ;;  %v677_v44 = vmul.f32 1.442695, %v666_v41  ;;  %v664_v45 = vsub.f32 0.0, %v2809_v42  ;;  %v2812_v46 = vadd.f32 %v2203_v43, %v578_v29  ;;  %v768_v41 = vld [vmem:[#allocation2 + $0x90] sm:$0xff]  ;;  %v769_v43 = vld [vmem:[#allocation2 + $0x98] sm:$0x3] }
 0x1d8   : > { %v648_v47 = vpop.f32.mrf.mxu1 }
 0x1d9   : > { %2374 = vpow2.f32 %v677_v44  ;;  %v673_v48 = vmul.f32 1.442695, %v664_v45  ;;  %v669_v49 = vsub.f32 0.0, %v2812_v46  ;;  %v2815_v50 = vadd.f32 %v648_v47, %v578_v29 }
 0x1da   : > { %v2204_v51 = vpop.f32.mrf.mxu1  ;;  %v2847_v45 = vrot.slane %v772_v35, %v2796_v28  ;;  %v2850_v47 = vrot.slane %v772_v35, %v2831_v12 }
 0x1db   : > { %2376 = vpow2.f32 %v673_v48  ;;  %v683_v52 = vmul.f32 1.442695, %v669_v49  ;;  %v667_v53 = vsub.f32 0.0, %v2815_v50  ;;  %v2818_v54 = vadd.f32 %v2204_v51, %v578_v29 }
 0x1dc   : > { %v651_v55 = vpop.f32.mrf.mxu1  ;;  %3539 = vst [vmem:[#allocation16_spill] sm:$0xff] %v2850_v47  ;;  %v777_v48 = vmul.f32 %v2839_v32, %v750_v18 }
 0x1dd   : > { %2378 = vpow2.f32 %v683_v52  ;;  %v679_v56 = vmul.f32 1.442695, %v667_v53  ;;  %v670_v57 = vsub.f32 0.0, %v2818_v54  ;;  %v2821_v58 = vadd.f32 %v651_v55, %v578_v29 }
 0x1de   : > { %v824_v52 = vsel %vm821_vm5, %v822_v33, %v823_v36  ;;  %v899_v53 = vrot.slane %v866_v37, 2  ;;  %v900_v55 = vrot.slane %v867_v39, 2 }
 0x1df   : > { %2380 = vpow2.f32 %v679_v56  ;;  %v668_v59 = vsub.f32 0.0, %v2821_v58  ;;  %v685_v60 = vmul.f32 1.442695, %v670_v57  ;;  %v1149_v57 = vmul.f32 %v2847_v45, %v768_v41 }
 0x1e1   : > { %v681_v62 = vmul.f32 1.442695, %v668_v59  ;;  %2382 = vpow2.f32 %v685_v60  ;;  %v1150_v59 = vmul.f32 %v2847_v45, %v769_v43  ;;  %v1225_v60 = vmul.f32 %v2850_v47, %v768_v41 }
 0x1e2   : > { %v2371_v61 = vpop.eup %2370 }
 0x1e3   : > { %v689_v63 = vadd.f32 1.0, %v2371_v61  ;;  %v1226_v61 = vmul.f32 %v2850_v47, %v769_v43  ;;  %v1189_v21 = vrot.slane %v1150_v59, 1 }
 0x1e4   : > { %v2373_v5 = vpop.eup %2372 }
 0x1e5   : > { %2384 = vrcp.f32 %v689_v63  ;;  %v687_v6 = vadd.f32 1.0, %v2373_v5 }
 0x1e6   : > { %v2375_v7 = vpop.eup %2374  ;;  %2386 = vpow2.f32 %v681_v62 }
 0x1e7   : > { %2388 = vrcp.f32 %v687_v6  ;;  %v690_v17 = vadd.f32 1.0, %v2375_v7  ;;  %v854_v7 = vadd.f32 %v824_v52, %v777_v48 }
 0x1e8   : > { %v2377_v20 = vpop.eup %2376 }
 0x1e9   : > { %2390 = vrcp.f32 %v690_v17  ;;  %v688_v22 = vadd.f32 1.0, %v2377_v20  ;;  %v901_v17 = vsel %vm898_vm6, %v899_v53, %v900_v55  ;;  %v1188_v20 = vrot.slane %v1149_v57, 1 }
 0x1ea   : > { %v2379_v23 = vpop.eup %2378 }
 0x1eb   : > { %2392 = vrcp.f32 %v688_v22  ;;  %v693_v26 = vadd.f32 1.0, %v2379_v23  ;;  %v1264_v22 = vrot.slane %v1225_v60, 2  ;;  %v1265_v23 = vrot.slane %v1226_v61, 2 }
 0x1ec   : > { %v2381_v29 = vpop.eup %2380  ;;  %v2893_v35 = vsel %vm821_vm5, %v1188_v20, %v1189_v21 }
 0x1ed   : > { %2394 = vrcp.f32 %v693_v26  ;;  %v691_v30 = vadd.f32 1.0, %v2381_v29  ;;  %3541 = vst [vmem:[#allocation18_spill] sm:$0xff] %v2893_v35  ;;  %v2896_v39 = vsel %vm898_vm6, %v1264_v22, %v1265_v23 }
 0x1ee   : > { %v2383_v40 = vpop.eup %2382  ;;  %3542 = vst [vmem:[#allocation19_spill] sm:$0xff] %v2896_v39 }
 0x1ef   : > { %2396 = vrcp.f32 %v691_v30  ;;  %v694_v63 = vadd.f32 1.0, %v2383_v40  ;;  %v2883_v30 = vadd.f32 %v901_v17, %v854_v7  ;;  %v2900_v40 = vrot.slane %v2674_v10, %v2831_v12 }
 0x1f1   : > { %2398 = vrcp.f32 %v694_v63  ;;  %3543 = vst [vmem:[#allocation20_spill] sm:$0xff] %v2900_v40 }
 0x1f2   : > { %v2385_v44 = vpop.eup %2384 }
 0x1f3   : > { %v2387_v49 = vpop.eup %2386  ;;  %v713_v51 = vmul.f32 %v2385_v44, %v2800_v31  ;;  %v771_v31 = vld [vmem:[%s3498_s3 + $0x4] sm:$0x7] }
 0x1f4   : > { %v2389_v56 = vpop.eup %2388  ;;  %v692_v5 = vadd.f32 1.0, %v2387_v49  ;;  %v2871_v24 = vrot.slane %v771_v31, %v2831_v12  ;;  %v2879_v29 = vrot.slane %v771_v31, %v2669_v9 }
 0x1f5   : > { %744 = vst.msk [vmem:[#allocation2 + $0x31] sm:$0xff] %vm719_vm2, %v713_v51  ;;  %v711_v62 = vmul.f32 %v2389_v56, %v2803_v34  ;;  %v2868_v34 = vrot.slane %v771_v31, %v2796_v28 }
 0x1f6   : > { %v2391_v4 = vpop.eup %2390  ;;  %2400 = vrcp.f32 %v692_v5 }
 0x1f7   : > { %742 = vst.msk [vmem:[#allocation2 + $0x11] sm:$0xff] %vm719_vm2, %v711_v62  ;;  %v714_v6 = vmul.f32 %v2391_v4, %v2806_v38 }
 0x1f8   : > { %v2393_v18 = vpop.eup %2392 }
 0x1f9   : > { %745 = vst.msk [vmem:[#allocation2 + $0x41] sm:$0xff] %vm719_vm2, %v714_v6  ;;  %v712_v26 = vmul.f32 %v2393_v18, %v2809_v42  ;;  %v2890_v42 = vmul.f32 %v2876_v27, %v768_v41 }
 0x1fa   : > { %v2395_v38 = vpop.eup %2394 }
 0x1fb   : > { %743 = vst.msk [vmem:[#allocation2 + $0x21] sm:$0xff] %vm719_vm2, %v712_v26  ;;  %v717_v28 = vmul.f32 %v2395_v38, %v2812_v46 }
 0x1fc   : > { %v2397_v33 = vpop.eup %2396  ;;  %v2885_v36 = vld [vmem:[#allocation2 + $0x30] sm:$0xff]  ;;  %v2887_v37 = vld [vmem:[#allocation2 + $0x38] sm:$0x3] }
 0x1fd   : > { %3540 = vst [vmem:[#allocation17_spill] sm:$0xff] %v2887_v37  ;;  %v2904_v46 = vmul.f32 %v2828_v11, %v2887_v37  ;;  %v2908_v43 = vmul.f32 %v2835_v25, %v2887_v37  ;;  %v2912_v41 = vmul.f32 %v2868_v34, %v2887_v37  ;;  %v2916_v44 = vmul.f32 %v2871_v24, %v2887_v37 }
 0x1fe   : > { %748 = vst.msk [vmem:[#allocation2 + $0x71] sm:$0xff] %vm719_vm2, %v717_v28  ;;  %v752_v10 = vld [vmem:[#allocation2 + $0x10] sm:$0xff]  ;;  %v753_v12 = vld [vmem:[#allocation2 + $0x18] sm:$0x3]  ;;  %v715_v48 = vmul.f32 %v2397_v33, %v2815_v50  ;;  %v2922_v49 = vmul.f32 %v2839_v32, %v2885_v36  ;;  %v2926_v51 = vmul.f32 %v2828_v11, %v2885_v36  ;;  %v2930_v52 = vmul.f32 %v2835_v25, %v2885_v36 }
 0x1ff   : > { %v778_v57 = vmul.f32 %v2839_v32, %v752_v10  ;;  %v791_v59 = vmul.f32 %v2828_v11, %v752_v10  ;;  %v792_v60 = vmul.f32 %v2828_v11, %v753_v12  ;;  %v868_v61 = vmul.f32 %v2835_v25, %v752_v10 }
 0x200   : > { %746 = vst.msk [vmem:[#allocation2 + $0x51] sm:$0xff] %vm719_vm2, %v715_v48  ;;  %v869_v62 = vmul.f32 %v2835_v25, %v753_v12  ;;  %v2943_v63 = vmul.f32 %v2879_v29, %v752_v10  ;;  %v963_v4 = vmul.f32 %v2868_v34, %v752_v10  ;;  %v964_v31 = vmul.f32 %v2868_v34, %v753_v12  ;;  %v2947_v5 = vld [vmem:[#allocation2 + $0x48] sm:$0x3] }
 0x201   : > { %v825_v6 = vrot.slane %v791_v59, 1  ;;  %v826_v7 = vrot.slane %v792_v60, 1  ;;  %v902_v17 = vrot.slane %v868_v61, 2  ;;  %v2950_v18 = vmul.f32 %v2871_v24, %v752_v10  ;;  %v2399_v61 = vpop.eup %2398 }
 0x202   : > { %v903_v20 = vrot.slane %v869_v62, 2  ;;  %v995_v21 = vrot.slane %v963_v4, 1  ;;  %v996_v22 = vrot.slane %v964_v31, 1  ;;  %v2953_v23 = vmul.f32 %v2871_v24, %v753_v12  ;;  %v2955_v26 = vld [vmem:[#allocation2 + $0x28] sm:$0x3] }
 0x203   : > { %v827_v38 = vsel %vm821_vm5, %v825_v6, %v826_v7  ;;  %v798_v33 = vmul.f32 %v2828_v11, %v2947_v5  ;;  %v2963_v48 = vmul.f32 %v2835_v25, %v2947_v5  ;;  %v2973_v31 = vmul.f32 %v2868_v34, %v2947_v5  ;;  %v2401_v7 = vpop.eup %2400 }
 0x204   : > { %v855_v10 = vadd.f32 %v827_v38, %v778_v57  ;;  %v904_v59 = vsel %vm898_vm6, %v902_v17, %v903_v20  ;;  %v2967_v60 = vsel %vm821_vm5, %v995_v21, %v996_v22  ;;  %v794_v6 = vmul.f32 %v2828_v11, %v2955_v26  ;;  %v2979_v17 = vld [vmem:[#allocation2 + $0x20] sm:$0xff] }
 0x205   : > { %v835_v62 = vrot.slane %v798_v33, 1  ;;  %v2983_v20 = vmul.f32 %v2835_v25, %v2955_v26  ;;  %v2987_v21 = vmul.f32 %v2868_v34, %v2955_v26  ;;  %v2991_v22 = vmul.f32 %v2871_v24, %v2955_v26  ;;  %v2995_v33 = vld [vmem:[#allocation2 + $0x40] sm:$0xff]  ;;  %v2998_v19 = vld [vmem:[#allocation2 + $0x70] sm:$0xff]  ;;  %v3009_v53 = vld [vmem:[#allocation2 + $0x78] sm:$0x3] }
 0x206   : > { %v2977_v57 = vadd.f32 %v904_v59, %v855_v10  ;;  %v829_v59 = vrot.slane %v794_v6, 1  ;;  %v718_v6 = vmul.f32 %v2399_v61, %v2818_v54  ;;  %v716_v13 = vmul.f32 %v2401_v7, %v2821_v58 }
 0x207   : > { %v2993_v38 = vld [vmem:[#allocation2 + $0x58] sm:$0x3]  ;;  %v3000_v50 = vld [vmem:[#allocation2 + $0x50] sm:$0xff]  ;;  %v906_v56 = vrot.slane %v2983_v20, 2  ;;  %v779_v15 = vmul.f32 %v2839_v32, %v2979_v17  ;;  %v781_v20 = vmul.f32 %v2839_v32, %v2995_v33  ;;  %v784_v55 = vmul.f32 %v2839_v32, %v2998_v19 }
 0x208   : > { %v800_v28 = vmul.f32 %v2828_v11, %v2993_v38  ;;  %v877_v12 = vmul.f32 %v2835_v25, %v2993_v38  ;;  %749 = vst.msk [vmem:[#allocation2 + $0x81] sm:$0xff] %vm719_vm2, %v718_v6  ;;  %v782_v4 = vmul.f32 %v2839_v32, %v3000_v50  ;;  %v793_v54 = vmul.f32 %v2828_v11, %v2979_v17 }
 0x209   : > { %747 = vst.msk [vmem:[#allocation2 + $0x61] sm:$0xff] %vm719_vm2, %v716_v13  ;;  %v797_v58 = vmul.f32 %v2828_v11, %v2995_v33  ;;  %v804_v61 = vmul.f32 %v2828_v11, %v3009_v53  ;;  %v831_v6 = vrot.slane %v2926_v51, 1  ;;  %v870_v14 = vmul.f32 %v2835_v25, %v2979_v17 }
 0x20a   : > { %v838_v10 = vrot.slane %v800_v28, 1  ;;  %v915_v16 = vrot.slane %v877_v12, 2  ;;  %v799_v28 = vmul.f32 %v2828_v11, %v3000_v50  ;;  %v803_v12 = vmul.f32 %v2828_v11, %v2998_v19 }
 0x20b   : > { %v828_v7 = vrot.slane %v793_v54, 1  ;;  %v874_v13 = vmul.f32 %v2835_v25, %v2995_v33  ;;  %v834_v3 = vrot.slane %v797_v58, 1  ;;  %v844_v0 = vrot.slane %v804_v61, 1 }
 0x20c   : > { %v837_v2 = vrot.slane %v799_v28, 1  ;;  %v843_v1 = vrot.slane %v803_v12, 1  ;;  %v3544_v9 = vrot.slane %v2904_v46, 1  ;;  %v876_v54 = vmul.f32 %v2835_v25, %v3000_v50 }
 0x20d   : > { %v830_v8 = vsel %vm821_vm5, %v828_v7, %v829_v59  ;;  %v880_v51 = vmul.f32 %v2835_v25, %v2998_v19  ;;  %v836_v39 = vsel %vm821_vm5, %v834_v3, %v835_v62  ;;  %v905_v7 = vrot.slane %v870_v14, 2 }
 0x20e   : > { %v833_v40 = vsel %vm821_vm5, %v831_v6, %v3544_v9  ;;  %v839_v47 = vsel %vm821_vm5, %v837_v2, %v838_v10  ;;  %v845_v58 = vsel %vm821_vm5, %v843_v1, %v844_v0  ;;  %v856_v28 = vadd.f32 %v830_v8, %v779_v15 }
 0x20f   : > { %v857_v12 = vadd.f32 %v833_v40, %v2922_v49  ;;  %v858_v59 = vadd.f32 %v836_v39, %v781_v20  ;;  %v859_v61 = vadd.f32 %v839_v47, %v782_v4  ;;  %v861_v46 = vadd.f32 %v845_v58, %v784_v55 }
 0x210   : > { %v881_v9 = vmul.f32 %v2835_v25, %v3009_v53  ;;  %v908_v6 = vrot.slane %v2930_v52, 2  ;;  %v911_v35 = vrot.slane %v874_v13, 2  ;;  %v3053_v37 = vld [vmem:[#allocation2 + $0x60] sm:$0xff]  ;;  %v3055_v3 = vld [vmem:[#allocation2 + $0x68] sm:$0x3]  ;;  %v914_v2 = vrot.slane %v876_v54, 2 }
 0x211   : > { %v920_v62 = vrot.slane %v880_v51, 2  ;;  %v944_v8 = vmul.f32 %v2879_v29, %v2979_v17  ;;  %v945_v0 = vmul.f32 %v2879_v29, %v2885_v36  ;;  %v802_v1 = vmul.f32 %v2828_v11, %v3055_v3  ;;  %v3079_v13 = vld [vmem:[#allocation2 + $0x80] sm:$0xff] }
 0x212   : > { %v783_v14 = vmul.f32 %v2839_v32, %v3053_v37  ;;  %v801_v15 = vmul.f32 %v2828_v11, %v3053_v37  ;;  %v878_v47 = vmul.f32 %v2835_v25, %v3053_v37  ;;  %v879_v39 = vmul.f32 %v2835_v25, %v3055_v3 }
 0x213   : > { %v907_v40 = vsel %vm898_vm6, %v905_v7, %v906_v56  ;;  %v3545_v49 = vrot.slane %v2908_v43, 2  ;;  %v3546_v55 = vrot.slane %v2963_v48, 2  ;;  %v841_v32 = vrot.slane %v802_v1, 1 }
 0x214   : > { %v840_v10 = vrot.slane %v801_v15, 1  ;;  %v916_v11 = vsel %vm898_vm6, %v914_v2, %v915_v16  ;;  %v917_v20 = vrot.slane %v878_v47, 2  ;;  %v918_v54 = vrot.slane %v879_v39, 2  ;;  %v3097_v15 = vld [vmem:[#allocation2 + $0x88] sm:$0x3] }
 0x215   : > { %v910_v52 = vsel %vm898_vm6, %v908_v6, %v3545_v49  ;;  %v913_v4 = vsel %vm898_vm6, %v911_v35, %v3546_v55  ;;  %v921_v51 = vrot.slane %v881_v9, 2  ;;  %v933_v25 = vadd.f32 %v907_v40, %v856_v28 }
 0x216   : > { %v934_v58 = vadd.f32 %v910_v52, %v857_v12  ;;  %v842_v56 = vsel %vm821_vm5, %v840_v10, %v841_v32  ;;  %v935_v43 = vadd.f32 %v913_v4, %v858_v59  ;;  %v936_v7 = vadd.f32 %v916_v11, %v859_v61 }
 0x217   : > { %v946_v48 = vmul.f32 %v2879_v29, %v2995_v33  ;;  %v860_v6 = vadd.f32 %v842_v56, %v783_v14  ;;  %v919_v35 = vsel %vm898_vm6, %v917_v20, %v918_v54  ;;  %v922_v1 = vsel %vm898_vm6, %v920_v62, %v921_v51 }
 0x218   : > { %v947_v16 = vmul.f32 %v2879_v29, %v3000_v50  ;;  %v938_v2 = vadd.f32 %v922_v1, %v861_v46  ;;  %v948_v28 = vmul.f32 %v2879_v29, %v3053_v37  ;;  %v949_v12 = vmul.f32 %v2879_v29, %v2998_v19 }
 0x219   : > { %v950_v59 = vmul.f32 %v2879_v29, %v3079_v13  ;;  %v937_v61 = vadd.f32 %v919_v35, %v860_v6  ;;  %v951_v9 = vadd.f32 %v2943_v63, %v2883_v30  ;;  %v952_v14 = vadd.f32 %v944_v8, %v2977_v57 }
 0x21a   : > { %v953_v62 = vadd.f32 %v945_v0, %v933_v25  ;;  %v954_v47 = vadd.f32 %v946_v48, %v934_v58  ;;  %v955_v46 = vadd.f32 %v947_v16, %v935_v43  ;;  %v956_v39 = vadd.f32 %v948_v28, %v936_v7 }
 0x21b   : > { %v958_v40 = vadd.f32 %v950_v59, %v938_v2  ;;  %v957_v49 = vadd.f32 %v949_v12, %v937_v61  ;;  %v965_v52 = vmul.f32 %v2868_v34, %v2979_v17  ;;  %v967_v29 = vmul.f32 %v2868_v34, %v2885_v36 }
 0x21c   : > { %v969_v55 = vmul.f32 %v2868_v34, %v2995_v33  ;;  %v971_v30 = vmul.f32 %v2868_v34, %v3000_v50  ;;  %v972_v63 = vmul.f32 %v2868_v34, %v2993_v38  ;;  %v973_v57 = vmul.f32 %v2868_v34, %v3053_v37 }
 0x21d   : > { %v974_v8 = vmul.f32 %v2868_v34, %v3055_v3  ;;  %v975_v0 = vmul.f32 %v2868_v34, %v2998_v19  ;;  %v976_v4 = vmul.f32 %v2868_v34, %v3009_v53  ;;  %v977_v32 = vmul.f32 %v2868_v34, %v3079_v13 }
 0x21e   : > { %v978_v10 = vmul.f32 %v2868_v34, %v3097_v15  ;;  %v998_v11 = vrot.slane %v965_v52, 1  ;;  %v1001_v20 = vrot.slane %v967_v29, 1  ;;  %v1004_v54 = vrot.slane %v969_v55, 1 }
 0x21f   : > { %v1007_v51 = vrot.slane %v971_v30, 1  ;;  %v1008_v25 = vrot.slane %v972_v63, 1  ;;  %v1010_v58 = vrot.slane %v973_v57, 1  ;;  %v1011_v56 = vrot.slane %v974_v8, 1 }
 0x220   : > { %v1013_v43 = vrot.slane %v975_v0, 1  ;;  %v3547_v7 = vrot.slane %v2987_v21, 1  ;;  %v3548_v6 = vrot.slane %v2912_v41, 1  ;;  %v3549_v1 = vrot.slane %v2973_v31, 1 }
 0x221   : > { %v1014_v16 = vrot.slane %v976_v4, 1  ;;  %v1009_v2 = vsel %vm821_vm5, %v1007_v51, %v1008_v25  ;;  %v1012_v28 = vsel %vm821_vm5, %v1010_v58, %v1011_v56  ;;  %v1016_v12 = vrot.slane %v977_v32, 1 }
 0x222   : > { %v1000_v48 = vsel %vm821_vm5, %v998_v11, %v3547_v7  ;;  %v1003_v35 = vsel %vm821_vm5, %v1001_v20, %v3548_v6  ;;  %v1006_v34 = vsel %vm821_vm5, %v1004_v54, %v3549_v1  ;;  %v1017_v59 = vrot.slane %v978_v10, 1 }
 0x223   : > { %v1015_v61 = vsel %vm821_vm5, %v1013_v43, %v1014_v16  ;;  %v1027_v21 = vadd.f32 %v2967_v60, %v951_v9  ;;  %v1028_v52 = vadd.f32 %v1000_v48, %v952_v14  ;;  %v1029_v29 = vadd.f32 %v1003_v35, %v953_v62 }
 0x224   : > { %v1018_v41 = vsel %vm821_vm5, %v1016_v12, %v1017_v59  ;;  %v1030_v55 = vadd.f32 %v1006_v34, %v954_v47  ;;  %v1031_v30 = vadd.f32 %v1009_v2, %v955_v46  ;;  %v1032_v31 = vadd.f32 %v1012_v28, %v956_v39 }
 0x225   : > { %v1033_v63 = vadd.f32 %v1015_v61, %v957_v49  ;;  %v1034_v57 = vadd.f32 %v1018_v41, %v958_v40  ;;  %v1041_v8 = vmul.f32 %v2871_v24, %v2979_v17  ;;  %v1043_v0 = vmul.f32 %v2871_v24, %v2885_v36 }
 0x226   : > { %v1045_v4 = vmul.f32 %v2871_v24, %v2995_v33  ;;  %v1046_v60 = vmul.f32 %v2871_v24, %v2947_v5  ;;  %v1047_v9 = vmul.f32 %v2871_v24, %v3000_v50  ;;  %v1048_v14 = vmul.f32 %v2871_v24, %v2993_v38 }
 0x227   : > { %v1049_v62 = vmul.f32 %v2871_v24, %v3053_v37  ;;  %v1050_v47 = vmul.f32 %v2871_v24, %v3055_v3  ;;  %v1051_v46 = vmul.f32 %v2871_v24, %v2998_v19  ;;  %v1052_v39 = vmul.f32 %v2871_v24, %v3009_v53 }
 0x228   : > { %v1053_v40 = vmul.f32 %v2871_v24, %v3079_v13  ;;  %v1054_v49 = vmul.f32 %v2871_v24, %v3097_v15  ;;  %v3550_v32 = vrot.slane %v2953_v23, 2  ;;  %v3551_v10 = vrot.slane %v2950_v18, 2 }
 0x229   : > { %v1074_v20 = vrot.slane %v1041_v8, 2  ;;  %v1077_v54 = vrot.slane %v1043_v0, 2  ;;  %v1080_v51 = vrot.slane %v1045_v4, 2  ;;  %v1081_v25 = vrot.slane %v1046_v60, 2 }
 0x22a   : > { %v1073_v11 = vsel %vm898_vm6, %v3551_v10, %v3550_v32  ;;  %v1083_v58 = vrot.slane %v1047_v9, 2  ;;  %v3552_v56 = vrot.slane %v2991_v22, 2  ;;  %v1084_v7 = vrot.slane %v1048_v14, 2 }
 0x22b   : > { %v1086_v48 = vrot.slane %v1049_v62, 2  ;;  %v1087_v6 = vrot.slane %v1050_v47, 2  ;;  %v3553_v24 = vrot.slane %v2916_v44, 2  ;;  %v1082_v18 = vsel %vm898_vm6, %v1080_v51, %v1081_v25 }
 0x22c   : > { %v1076_v43 = vsel %vm898_vm6, %v1074_v20, %v3552_v56  ;;  %v1089_v35 = vrot.slane %v1051_v46, 2  ;;  %v1090_v1 = vrot.slane %v1052_v39, 2  ;;  %v1085_v34 = vsel %vm898_vm6, %v1083_v58, %v1084_v7 }
 0x22d   : > { %v1079_v23 = vsel %vm898_vm6, %v1077_v54, %v3553_v24  ;;  %v1088_v16 = vsel %vm898_vm6, %v1086_v48, %v1087_v6  ;;  %v1092_v2 = vrot.slane %v1053_v40, 2  ;;  %v1093_v28 = vrot.slane %v1054_v49, 2 }
 0x22e   : > { %v1091_v22 = vsel %vm898_vm6, %v1089_v35, %v1090_v1  ;;  %v1103_v12 = vadd.f32 %v1073_v11, %v1027_v21  ;;  %v1104_v59 = vadd.f32 %v1076_v43, %v1028_v52  ;;  %v1105_v61 = vadd.f32 %v1079_v23, %v1029_v29  ;;  %v3554_v11 = vld [vmem:[#allocation17_spill] sm:$0xff] }
 0x22f   : > { %v1094_v41 = vsel %vm898_vm6, %v1092_v2, %v1093_v28  ;;  %v1106_v44 = vadd.f32 %v1082_v18, %v1030_v55  ;;  %v1107_v8 = vadd.f32 %v1085_v34, %v1031_v30  ;;  %v1108_v0 = vadd.f32 %v1088_v16, %v1032_v31 }
 0x230   : > { %v1109_v4 = vadd.f32 %v1091_v22, %v1033_v63  ;;  %v1110_v60 = vadd.f32 %v1094_v41, %v1034_v57  ;;  %v1115_v9 = vmul.f32 %v2876_v27, %v2979_v17  ;;  %v1116_v14 = vmul.f32 %v2876_v27, %v2885_v36 }
 0x231   : > { %v1117_v62 = vmul.f32 %v2876_v27, %v2995_v33  ;;  %v1118_v21 = vmul.f32 %v2876_v27, %v3000_v50  ;;  %v1119_v52 = vmul.f32 %v2876_v27, %v3053_v37  ;;  %v1120_v29 = vmul.f32 %v2876_v27, %v2998_v19 }
 0x232   : > { %v1121_v55 = vmul.f32 %v2876_v27, %v3079_v13  ;;  %v1123_v30 = vadd.f32 %v1115_v9, %v1103_v12  ;;  %v1124_v31 = vadd.f32 %v1116_v14, %v1104_v59  ;;  %v1130_v63 = vadd.f32 %v2890_v42, %v1110_v60 }
 0x233   : > { %v1125_v57 = vadd.f32 %v1117_v62, %v1105_v61  ;;  %v1126_v47 = vadd.f32 %v1118_v21, %v1106_v44  ;;  %v1127_v46 = vadd.f32 %v1119_v52, %v1107_v8  ;;  %v1128_v39 = vadd.f32 %v1120_v29, %v1108_v0 }
 0x234   : > { %v1129_v40 = vadd.f32 %v1121_v55, %v1109_v4  ;;  %v1135_v49 = vmul.f32 %v2847_v45, %v2979_v17  ;;  %v1136_v32 = vmul.f32 %v2847_v45, %v2955_v26  ;;  %v1137_v10 = vmul.f32 %v2847_v45, %v2885_v36  ;;  %v3555_v55 = vld [vmem:[#allocation18_spill] sm:$0xff] }
 0x235   : > { %v1138_v27 = vmul.f32 %v2847_v45, %v3554_v11  ;;  %v1139_v42 = vmul.f32 %v2847_v45, %v2995_v33  ;;  %v1140_v20 = vmul.f32 %v2847_v45, %v2947_v5  ;;  %v1141_v54 = vmul.f32 %v2847_v45, %v3000_v50 }
 0x236   : > { %v1142_v51 = vmul.f32 %v2847_v45, %v2993_v38  ;;  %v1143_v25 = vmul.f32 %v2847_v45, %v3053_v37  ;;  %v1144_v58 = vmul.f32 %v2847_v45, %v3055_v3  ;;  %v1145_v56 = vmul.f32 %v2847_v45, %v2998_v19 }
 0x237   : > { %v1146_v43 = vmul.f32 %v2847_v45, %v3009_v53  ;;  %v1147_v7 = vmul.f32 %v2847_v45, %v3079_v13  ;;  %v1148_v48 = vmul.f32 %v2847_v45, %v3097_v15  ;;  %v1167_v6 = vrot.slane %v1135_v49, 1 }
 0x238   : > { %v1168_v24 = vrot.slane %v1136_v32, 1  ;;  %v1170_v23 = vrot.slane %v1137_v10, 1  ;;  %v1171_v18 = vrot.slane %v1138_v27, 1  ;;  %v1173_v35 = vrot.slane %v1139_v42, 1  ;;  %v3556_v32 = vld [vmem:[#allocation16_spill] sm:$0xff] }
 0x239   : > { %v1174_v1 = vrot.slane %v1140_v20, 1  ;;  %v1176_v34 = vrot.slane %v1141_v54, 1  ;;  %v1177_v16 = vrot.slane %v1142_v51, 1  ;;  %v1179_v2 = vrot.slane %v1143_v25, 1 }
 0x23a   : > { %v1169_v28 = vsel %vm821_vm5, %v1167_v6, %v1168_v24  ;;  %v1172_v22 = vsel %vm821_vm5, %v1170_v23, %v1171_v18  ;;  %v1180_v12 = vrot.slane %v1144_v58, 1  ;;  %v1182_v59 = vrot.slane %v1145_v56, 1 }
 0x23b   : > { %v1175_v61 = vsel %vm821_vm5, %v1173_v35, %v1174_v1  ;;  %v1178_v41 = vsel %vm821_vm5, %v1176_v34, %v1177_v16  ;;  %v1183_v45 = vrot.slane %v1146_v43, 1  ;;  %v1185_v44 = vrot.slane %v1147_v7, 1 }
 0x23c   : > { %v1181_v8 = vsel %vm821_vm5, %v1179_v2, %v1180_v12  ;;  %v1186_v0 = vrot.slane %v1148_v48, 1  ;;  %v1199_v4 = vadd.f32 %v1169_v28, %v1123_v30  ;;  %v1200_v60 = vadd.f32 %v1172_v22, %v1124_v31  ;;  %v3557_v28 = vld [vmem:[#allocation19_spill] sm:$0xff]  ;;  %v3558_v12 = vld [vmem:[#allocation20_spill] sm:$0xff] }
 0x23d   : > { %v1184_v9 = vsel %vm821_vm5, %v1182_v59, %v1183_v45  ;;  %v1201_v14 = vadd.f32 %v1175_v61, %v1125_v57  ;;  %v1202_v62 = vadd.f32 %v1178_v41, %v1126_v47  ;;  %v1203_v21 = vadd.f32 %v1181_v8, %v1127_v46 }
 0x23e   : > { %v1187_v52 = vsel %vm821_vm5, %v1185_v44, %v1186_v0  ;;  %v1204_v29 = vadd.f32 %v1184_v9, %v1128_v39  ;;  %v1206_v49 = vadd.f32 %v3555_v55, %v1130_v63  ;;  %v1211_v10 = vmul.f32 %v3556_v32, %v2979_v17 }
 0x23f   : > { %v1205_v27 = vadd.f32 %v1187_v52, %v1129_v40  ;;  %v1212_v42 = vmul.f32 %v3556_v32, %v2955_v26  ;;  %v1213_v30 = vmul.f32 %v3556_v32, %v2885_v36  ;;  %v1214_v31 = vmul.f32 %v3556_v32, %v3554_v11 }
 0x240   : > { %v1215_v57 = vmul.f32 %v3556_v32, %v2995_v33  ;;  %v1216_v47 = vmul.f32 %v3556_v32, %v2947_v5  ;;  %v1217_v63 = vmul.f32 %v3556_v32, %v3000_v50  ;;  %v1218_v17 = vmul.f32 %v3556_v32, %v2993_v38 }
 0x241   : > { %v1219_v26 = vmul.f32 %v3556_v32, %v3053_v37  ;;  %v1220_v36 = vmul.f32 %v3556_v32, %v3055_v3  ;;  %v1221_v46 = vmul.f32 %v3556_v32, %v2998_v19  ;;  %v1222_v33 = vmul.f32 %v3556_v32, %v3009_v53 }
 0x242   : > { %v1223_v5 = vmul.f32 %v3556_v32, %v3079_v13  ;;  %v1224_v50 = vmul.f32 %v3556_v32, %v3097_v15  ;;  %v1243_v39 = vrot.slane %v1211_v10, 2  ;;  %v1244_v38 = vrot.slane %v1212_v42, 2 }
 0x243   : > { %v1246_v40 = vrot.slane %v1213_v30, 2  ;;  %v1247_v11 = vrot.slane %v1214_v31, 2  ;;  %v1249_v37 = vrot.slane %v1215_v57, 2  ;;  %v1250_v20 = vrot.slane %v1216_v47, 2 }
 0x244   : > { %v1245_v3 = vsel %vm898_vm6, %v1243_v39, %v1244_v38  ;;  %v1252_v54 = vrot.slane %v1217_v63, 2  ;;  %v1253_v51 = vrot.slane %v1218_v17, 2  ;;  %v1255_v19 = vrot.slane %v1219_v26, 2 }
 0x245   : > { %v1248_v25 = vsel %vm898_vm6, %v1246_v40, %v1247_v11  ;;  %v1251_v53 = vsel %vm898_vm6, %v1249_v37, %v1250_v20  ;;  %v1256_v58 = vrot.slane %v1220_v36, 2  ;;  %v1258_v13 = vrot.slane %v1221_v46, 2 }
 0x246   : > { %v1254_v56 = vsel %vm898_vm6, %v1252_v54, %v1253_v51  ;;  %v1259_v15 = vrot.slane %v1222_v33, 2  ;;  %v1261_v43 = vrot.slane %v1223_v5, 2  ;;  %v1262_v7 = vrot.slane %v1224_v50, 2 }
 0x247   : > { %v1257_v48 = vsel %vm898_vm6, %v1255_v19, %v1256_v58  ;;  %v1275_v6 = vadd.f32 %v1245_v3, %v1199_v4  ;;  %v1276_v24 = vadd.f32 %v1248_v25, %v1200_v60  ;;  %v1277_v23 = vadd.f32 %v1251_v53, %v1201_v14 }
 0x248   : > { %v1260_v18 = vsel %vm898_vm6, %v1258_v13, %v1259_v15  ;;  %v1263_v35 = vsel %vm898_vm6, %v1261_v43, %v1262_v7  ;;  %v1278_v1 = vadd.f32 %v1254_v56, %v1202_v62  ;;  %v1279_v34 = vadd.f32 %v1257_v48, %v1203_v21 }
 0x249   : > { %v1280_v16 = vadd.f32 %v1260_v18, %v1204_v29  ;;  %v1281_v2 = vadd.f32 %v1263_v35, %v1205_v27  ;;  %v1282_v22 = vadd.f32 %v3557_v28, %v1206_v49  ;;  %v1287_v59 = vadd.f32 %v3558_v12, %v1275_v6 }
 0x24a   : > { %v1288_v61 = vadd.f32 %v3558_v12, %v1276_v24  ;;  %v1289_v41 = vadd.f32 %v3558_v12, %v1277_v23  ;;  %v1290_v45 = vadd.f32 %v3558_v12, %v1278_v1  ;;  %v3267_v44 = vadd.f32 %v3558_v12, %v1279_v34 }
 0x24b   : > { %v3270_v8 = vadd.f32 %v3558_v12, %v1280_v16  ;;  %v3273_v0 = vadd.f32 %v3558_v12, %v1281_v2  ;;  %v3276_v4 = vadd.f32 %v3558_v12, %v1282_v22  ;;  %v1295_v60 = vsub.f32 0.0, %v1287_v59 }
 0x24c   : > { %v1296_v9 = vsub.f32 0.0, %v1288_v61  ;;  %v1297_v14 = vsub.f32 0.0, %v1289_v41  ;;  %v1298_v62 = vsub.f32 0.0, %v1290_v45  ;;  %v1299_v21 = vsub.f32 0.0, %v3267_v44 }
 0x24d   : > { %v1300_v52 = vsub.f32 0.0, %v3270_v8  ;;  %v1301_v29 = vsub.f32 0.0, %v3273_v0  ;;  %v1302_v55 = vsub.f32 0.0, %v3276_v4  ;;  %v1303_v49 = vmul.f32 1.442695, %v1295_v60 }
 0x24e   : > { %v1305_v32 = vmul.f32 1.442695, %v1296_v9  ;;  %v1307_v10 = vmul.f32 1.442695, %v1297_v14  ;;  %v1309_v27 = vmul.f32 1.442695, %v1298_v62 }
 0x24f   : > { %2402 = vpow2.f32 %v1303_v49  ;;  %v1311_v42 = vmul.f32 1.442695, %v1299_v21  ;;  %v1313_v30 = vmul.f32 1.442695, %v1300_v52  ;;  %v1315_v31 = vmul.f32 1.442695, %v1301_v29 }
 0x250   : > { %2404 = vpow2.f32 %v1305_v32  ;;  %v1317_v57 = vmul.f32 1.442695, %v1302_v55  ;;  %v1465_v29 = vld [vmem:[%s3500_s5] sm:$0xf] }
 0x251   : > { %2406 = vpow2.f32 %v1307_v10  ;;  %2225 = vmatpush3.msk.msra.mxu0 %vm1472_vm7, %v1465_v29  ;;  %v3325_v55 = vld [vmem:[%s3505_s10] sm:$0xff] }
 0x252   : > { %2408 = vpow2.f32 %v1309_v27  ;;  %v1383_v49 = vrot.slane %v3325_v55, 3 }
 0x253   : > { %2410 = vpow2.f32 %v1311_v42 }
 0x254   : > { %2412 = vpow2.f32 %v1313_v30 }
 0x255   : > { %2414 = vpow2.f32 %v1315_v31 }
 0x256   : > { %2416 = vpow2.f32 %v1317_v57 }
 0x25c   : > { %v2403_v47 = vpop.eup %2402 }
 0x25d   : > { %v2405_v63 = vpop.eup %2404  ;;  %v1319_v17 = vadd.f32 1.0, %v2403_v47 }
 0x25e   : > { %v2407_v26 = vpop.eup %2406  ;;  %v1320_v36 = vadd.f32 1.0, %v2405_v63 }
 0x25f   : > { %v2409_v46 = vpop.eup %2408  ;;  %v1321_v33 = vadd.f32 1.0, %v2407_v26  ;;  %2418 = vrcp.f32 %v1319_v17  ;;  %v2333_v17 = vld [vmem:[%s3501_s6 + $0x18] sm:$0xff]   ;;  %v2334_v26 = vld [vmem:[%s3501_s6 + $0x10] sm:$0xff]  }
 0x260   : > { %v2411_v5 = vpop.eup %2410  ;;  %v1322_v50 = vadd.f32 1.0, %v2409_v46  ;;  %2420 = vrcp.f32 %v1320_v36  ;;  %2229 = vmatprep.subr.bf16.mxu1 %v2333_v17  ;;  %v2335_v36 = vld [vmem:[%s3501_s6 + $0x8] sm:$0xff]   ;;  %v2336_v46 = vld [vmem:[%s3501_s6] sm:$0xff]  }
 0x261   : > { %v2413_v39 = vpop.eup %2412  ;;  %v1323_v38 = vadd.f32 1.0, %v2411_v5  ;;  %2422 = vrcp.f32 %v1321_v33  ;;  %v1466_v33 = vrot.slane %v3325_v55, 4 }
 0x262   : > { %v2415_v40 = vpop.eup %2414  ;;  %v1324_v11 = vadd.f32 1.0, %v2413_v39  ;;  %2424 = vrcp.f32 %v1322_v50 }
 0x263   : > { %v2417_v37 = vpop.eup %2416  ;;  %v1325_v20 = vadd.f32 1.0, %v2415_v40  ;;  %2426 = vrcp.f32 %v1323_v38 }
 0x264   : > { %v1326_v3 = vadd.f32 1.0, %v2417_v37  ;;  %2428 = vrcp.f32 %v1324_v11 }
 0x265   : > { %2430 = vrcp.f32 %v1325_v20 }
 0x266   : > { %2432 = vrcp.f32 %v1326_v3  ;;  %v3559_v3 = vld [vmem:[#allocation7_spill] sm:$0xff] }
 0x26c   : > { %v2419_v54 = vpop.eup %2418 }
 0x26d   : > { %v2421_v51 = vpop.eup %2420  ;;  %v3282_v19 = vmul.f32 %v2419_v54, %v1287_v59 }
 0x26e   : > { %v2423_v25 = vpop.eup %2422  ;;  %v3284_v53 = vmul.f32 %v2421_v51, %v1288_v61 }
 0x26f   : > { %v2425_v58 = vpop.eup %2424  ;;  %v3286_v13 = vmul.f32 %v2423_v25, %v1289_v41  ;;  %v1351_v43 = vsel %vm719_vm2, %v3282_v19, 0.0 }
 0x270   : > { %v2427_v56 = vpop.eup %2426  ;;  %v3288_v15 = vmul.f32 %v2425_v58, %v1290_v45  ;;  %v1352_v7 = vsel %vm719_vm2, %v3284_v53, 0.0 }
 0x271   : > { %v2429_v48 = vpop.eup %2428  ;;  %v1353_v6 = vadd.f32 %v1352_v7, %v1351_v43  ;;  %v1354_v24 = vsel %vm719_vm2, %v3286_v13, 0.0  ;;  %v3297_v18 = vmul.f32 %v2427_v56, %v3267_v44 }
 0x272   : > { %v2431_v23 = vpop.eup %2430  ;;  %v3300_v1 = vmul.f32 %v2429_v48, %v3270_v8  ;;  %v1356_v16 = vsel %vm719_vm2, %v3288_v15, 0.0 }
 0x273   : > { %v1355_v35 = vadd.f32 %v1354_v24, %v1353_v6  ;;  %v3303_v34 = vmul.f32 %v2431_v23, %v3273_v0  ;;  %v2433_v2 = vpop.eup %2432  ;;  %v1358_v22 = vsel %vm719_vm2, %v3297_v18, 0.0  ;;  %v3560_v23 = vmov 0.0  }
 0x274   : > { %v3310_v59 = vmul.f32 %v2433_v2, %v3276_v4  ;;  %v1360_v61 = vsel %vm719_vm2, %v3300_v1, 0.0 }
 0x275   : > { %v1357_v28 = vadd.f32 %v1356_v16, %v1355_v35  ;;  %v1362_v41 = vsel %vm719_vm2, %v3303_v34, 0.0 }
 0x276   : > { %v1364_v8 = vsel %vm719_vm2, %v3310_v59, 0.0 }
 0x277   : > { %v1359_v12 = vadd.f32 %v1358_v22, %v1357_v28 }
 0x279   : > { %v1361_v45 = vadd.f32 %v1360_v61, %v1359_v12 }
 0x27b   : > { %v1363_v44 = vadd.f32 %v1362_v41, %v1361_v45  ;;  %v3562_v41 = vld [vmem:[#allocation8_spill] sm:$0xff] }
 0x27d   : > { %v1365_v0 = vadd.f32 %v1364_v8, %v1363_v44  ;;  %v3563_v8 = vld [vmem:[#allocation9_spill] sm:$0xff] }
 0x27f   : > { %v1366_v60 = vrot.slane %v1365_v0, 4 }
 0x281   : > { %v1367_v9 = vadd.f32 %v1366_v60, %v1365_v0  ;;  %v3564_v60 = vld [vmem:[#allocation10_spill] sm:$0xff] }
 0x283   : > { %v1368_v14 = vrot.slane %v1367_v9, 2 }
 0x285   : > { %v1369_v62 = vadd.f32 %v1368_v14, %v1367_v9  ;;  %v3565_v14 = vld [vmem:[#allocation11_spill] sm:$0xff] }
 0x287   : > { %v1370_v21 = vrot.slane %v1369_v62, 1 }
 0x289   : > { %v1371_v52 = vadd.f32 %v1370_v21, %v1369_v62 }
 0x28b   : > { %v1373_v4 = vmul.f32 0.015625, %v1371_v52 }
 0x28d   : > { %2222 = vmatmul.mubr.msk.f32.vlgmr.msra.gmra.mxu1 %vm719_vm2, %v1373_v4 }
 0x28e   : > { %2230 = vmatpush3.bf16.msra.mxu1 %v2333_v17 }
 0x28f   : > { %2231 = vmatprep.subr.bf16.mxu1 %v2334_v26 }
 0x292   : > { %2232 = vmatpush3.bf16.msra.mxu1 %v2334_v26  ;;  %v3569_v26 = vld [vmem:[#allocation15_spill] sm:$0xff] }
 0x293   : > { %2233 = vmatprep.subr.bf16.mxu1 %v2335_v36 }
 0x296   : > { %2234 = vmatpush3.bf16.msra.mxu1 %v2335_v36 }
 0x297   : > { %2235 = vmatprep.subr.bf16.mxu1 %v2336_v46 }
 0x29a   : > { %2236 = vmatpush3.bf16.msra.mxu1 %v2336_v46 }
 0x34d   : > { %v1454_v32 = vpop.f32.mrf.mxu1 }
 0x34e   : > { %v1455_v10 = vadd.f32 %v1454_v32, %v1383_v49 }
 0x34f   : > { %v2223_v27 = vpop.f32.mrf.mxu1 }
 0x350   : > { %v1458_v42 = vsub.f32 0.0, %v1455_v10 }
 0x352   : > { %v1459_v30 = vmul.f32 1.442695, %v1458_v42 }
 0x354   : > { %2434 = vpow2.f32 %v1459_v30  ;;  %v3566_v30 = vld [vmem:[#allocation12_spill] sm:$0xff] }
 0x361   : > { %v2435_v31 = vpop.eup %2434 }
 0x362   : > { %v1461_v57 = vadd.f32 1.0, %v2435_v31 }
 0x364   : > { %2436 = vrcp.f32 %v1461_v57  ;;  %v3567_v57 = vld [vmem:[#allocation13_spill] sm:$0xff] }
 0x371   : > { %v2437_v47 = vpop.eup %2436 }
 0x372   : > { %v1464_v63 = vmul.f32 %v2437_v47, %v1455_v10 }
 0x374   : > { %2227 = vmatmul.mubr.msk.f32.vlgmr.msra.gmra.mxu0 %vm1468_vm8, %v1464_v63  ;;  %v3568_v63 = vld [vmem:[#allocation14_spill] sm:$0xff] }
 0x434   : > { %v1542_v5 = vpop.f32.mrf.mxu0 }
 0x435   : > { %v1543_v50 = vadd.f32 %v1542_v5, %v1466_v33  ;;  %v1867_v5 = vld [vmem:[%s3503_s8 + $0x38] sm:$0xff] }
 0x436   : > { %v2228_v39 = vpop.f32.mrf.mxu0 }
 0x437   : > { %v1546_v38 = vsub.f32 0.0, %v1543_v50  ;;  %v1866_v50 = vld [vmem:[%s3503_s8 + $0x30] sm:$0xff]  ;;  %v1865_v39 = vld [vmem:[%s3503_s8 + $0x28] sm:$0xff] }
 0x439   : > { %v1547_v40 = vmul.f32 1.442695, %v1546_v38  ;;  %v1864_v38 = vld [vmem:[%s3503_s8 + $0x20] sm:$0xff] }
 0x43b   : > { %2438 = vpow2.f32 %v1547_v40  ;;  %v1863_v40 = vld [vmem:[%s3503_s8 + $0x18] sm:$0xff] }
 0x448   : > { %v2439_v11 = vpop.eup %2438 }
 0x449   : > { %v1549_v37 = vadd.f32 1.0, %v2439_v11  ;;  %v1862_v11 = vld [vmem:[%s3503_s8 + $0x10] sm:$0xff] }
 0x44b   : > { %2440 = vrcp.f32 %v1549_v37  ;;  %v1861_v37 = vld [vmem:[%s3503_s8 + $0x8] sm:$0xff] }
 0x458   : > { %v2441_v20 = vpop.eup %2440 }
 0x459   : > { %v1555_v54 = vrot.slane %v2441_v20, %v3559_v3  ;;  %v1860_v20 = vld [vmem:[%s3503_s8] sm:$0xff] }
 0x45b   : > { %v1556_v51 = vmul.f32 %v1555_v54, %v3282_v19  ;;  %v1557_v25 = vmul.f32 %v1555_v54, %v3284_v53  ;;  %v1558_v58 = vmul.f32 %v1555_v54, %v3286_v13  ;;  %v1559_v56 = vmul.f32 %v1555_v54, %v3288_v15  ;;  %v2337_v15 = vld [vmem:[%s3502_s7] sm:$0xff]  }
 0x45c   : > { %v1560_v43 = vmul.f32 %v1555_v54, %v3297_v18  ;;  %v1561_v7 = vmul.f32 %v1555_v54, %v3300_v1  ;;  %v1562_v19 = vmul.f32 %v1555_v54, %v3303_v34  ;;  %v1563_v53 = vmul.f32 %v1555_v54, %v3310_v59  ;;  %2245 = vmatprep.subr.bf16.mxu0 %v2337_v15  ;;  %v3561_v18 = vld [vmem:[#allocation6_spill] sm:$0xff] }
 0x45d   : > { %v1564_v48 = vpack.c.bf16 %v1557_v25, %v1556_v51  ;;  %v1565_v6 = vpack.c.bf16 %v1559_v56, %v1558_v58  ;;  %2246 = vmatpush3.bf16.msra.mxu0 %v2337_v15  ;;  %v1578_v35 = vsub.s32 5, %v3561_v18  ;;  %v1697_v3 = vsub.s32 6, %v3561_v18 }
 0x45e   : > { %v1566_v24 = vpack.c.bf16 %v1561_v7, %v1560_v43  ;;  %v1567_v13 = vpack.c.bf16 %v1563_v53, %v1562_v19  ;;  %2255 = vmatprep.subr.mxu0 %v3560_v23 }
 0x45f   : > { %2237 = vmatprep.mubr.msk.bf16.mxu1 %vm719_vm2, %v1564_v48  ;;  %v1579_v16 = vrot.slane %v3325_v55, %v1578_v35  ;;  %v1698_v54 = vrot.slane %v3325_v55, %v1697_v3 }
 0x460   : > { %2238 = vmatmul.mubr.msk.bf16.vlgmr.msra.gmra.mxu1 %vm719_vm2, %v1565_v6 }
 0x461   : > { %2241 = vmatprep.mubr.msk.bf16.mxu1 %vm719_vm2, %v1566_v24 }
 0x468   : > { %2242 = vmatmul.mubr.msk.bf16.gmra.mxu1 %vm719_vm2, %v1567_v13 }
 0x520   : > { %v2239_v1 = vpop.f32.mrf.mxu1 }
 0x521   : > { %v1659_v12 = vadd.f32 %v2239_v1, %v1579_v16 }
 0x522   : > { %v1650_v2 = vpop.f32.mrf.mxu1 }
 0x523   : > { %v1651_v28 = vadd.f32 %v1650_v2, %v1579_v16  ;;  %v1683_v62 = vadd.f32 %v1659_v12, %v3565_v14 }
 0x524   : > { %v2240_v34 = vpop.f32.mrf.mxu1 }
 0x525   : > { %v1662_v22 = vadd.f32 %v2240_v34, %v1579_v16  ;;  %v1681_v0 = vadd.f32 %v1651_v28, %v3563_v8 }
 0x526   : > { %v1653_v59 = vpop.f32.mrf.mxu1 }
 0x527   : > { %v1654_v61 = vadd.f32 %v1653_v59, %v1579_v16  ;;  %v1684_v45 = vadd.f32 %v1662_v22, %v3562_v41 }
 0x528   : > { %v2243_v44 = vpop.f32.mrf.mxu1 }
 0x529   : > { %v1682_v9 = vadd.f32 %v1654_v61, %v3564_v60  ;;  %v1690_v4 = vpack.c.bf16 %v1684_v45, %v1683_v62  ;;  %v1675_v10 = vadd.f32 %v2243_v44, %v1579_v16 }
 0x52a   : > { %v1666_v21 = vpop.f32.mrf.mxu1 }
 0x52b   : > { %v1689_v52 = vpack.c.bf16 %v1682_v9, %v1681_v0  ;;  %v1667_v49 = vadd.f32 %v1666_v21, %v1579_v16  ;;  %v1687_v36 = vadd.f32 %v1675_v10, %v3569_v26 }
 0x52c   : > { %v2244_v29 = vpop.f32.mrf.mxu1 }
 0x52d   : > { %v1678_v32 = vadd.f32 %v2244_v29, %v1579_v16  ;;  %2247 = vmatprep.mubr.msk.bf16.mxu0 %vm585_vm1, %v1689_v52  ;;  %v1685_v47 = vadd.f32 %v1667_v49, %v3567_v57 }
 0x52e   : > { %v1669_v27 = vpop.f32.mrf.mxu1  ;;  %2248 = vmatmul.mubr.msk.bf16.vlgmr.msra.gmra.mxu0 %vm585_vm1, %v1690_v4 }
 0x52f   : > { %v1670_v42 = vadd.f32 %v1669_v27, %v1579_v16  ;;  %v1688_v31 = vadd.f32 %v1678_v32, %v3566_v30  ;;  %2256 = vmatpush3.msra.mxu0 %v1867_v5 }
 0x530   : > { %2257 = vmatprep.subr.mxu0 %v3560_v23 }
 0x531   : > { %v1686_v17 = vadd.f32 %v1670_v42, %v3568_v63  ;;  %v1692_v33 = vpack.c.bf16 %v1688_v31, %v1687_v36  ;;  %2258 = vmatpush3.msra.mxu0 %v1866_v50 }
 0x532   : > { %2259 = vmatprep.subr.mxu0 %v3560_v23 }
 0x533   : > { %v1691_v46 = vpack.c.bf16 %v1686_v17, %v1685_v47  ;;  %2260 = vmatpush3.msra.mxu0 %v1865_v39 }
 0x534   : > { %2261 = vmatprep.subr.mxu0 %v3560_v23 }
 0x535   : > { %2251 = vmatprep.mubr.msk.bf16.mxu0 %vm585_vm1, %v1691_v46  ;;  %2262 = vmatpush3.msra.mxu0 %v1864_v38 }
 0x536   : > { %2252 = vmatmul.mubr.msk.bf16.gmra.mxu0 %vm585_vm1, %v1692_v33  ;;  %2263 = vmatprep.subr.mxu0 %v3560_v23 }
 0x537   : > { %2271 = vmatprep.mubr.msk.f32.mxu0 %vm2538_vm4, %v3560_v23  ;;  %2264 = vmatpush3.msra.mxu0 %v1863_v40 }
 0x538   : > { %2265 = vmatprep.subr.mxu0 %v3560_v23 }
 0x539   : > { %2266 = vmatpush3.msra.mxu0 %v1862_v11 }
 0x53a   : > { %2267 = vmatprep.subr.mxu0 %v3560_v23 }
 0x53b   : > { %2268 = vmatpush3.msra.mxu0 %v1861_v37 }
 0x53c   : > { %2269 = vmatprep.subr.mxu0 %v3560_v23 }
 0x53d   : > { %2270 = vmatpush3.msra.mxu0 %v1860_v20 }
 0x53e   : > { %2274 = vmatprep.subr.mxu0 %v3560_v23 }
 0x5ee   : > { %v2249_v51 = vpop.f32.mrf.mxu0 }
 0x5ef   : > { %v3408_v25 = vadd.f32 %v2249_v51, %v1698_v54 }
 0x5f0   : > { %v1751_v58 = vpop.f32.mrf.mxu0 }
 0x5f1   : > { %v1784_v56 = vsub.f32 0.0, %v3408_v25  ;;  %v3411_v43 = vadd.f32 %v1751_v58, %v1698_v54 }
 0x5f2   : > { %v2250_v7 = vpop.f32.mrf.mxu0 }
 0x5f3   : > { %v1794_v48 = vmul.f32 1.442695, %v1784_v56  ;;  %v1782_v6 = vsub.f32 0.0, %v3411_v43  ;;  %v3414_v24 = vadd.f32 %v2250_v7, %v1698_v54 }
 0x5f4   : > { %v1754_v19 = vpop.f32.mrf.mxu0 }
 0x5f5   : > { %2442 = vpow2.f32 %v1794_v48  ;;  %v1790_v53 = vmul.f32 1.442695, %v1782_v6  ;;  %v1785_v13 = vsub.f32 0.0, %v3414_v24  ;;  %v1755_v15 = vadd.f32 %v1754_v19, %v1698_v54 }
 0x5f6   : > { %v2253_v18 = vpop.f32.mrf.mxu0 }
 0x5f7   : > { %2444 = vpow2.f32 %v1790_v53  ;;  %v1796_v35 = vmul.f32 1.442695, %v1785_v13  ;;  %v1783_v1 = vsub.f32 0.0, %v1755_v15  ;;  %v3417_v16 = vadd.f32 %v2253_v18, %v1698_v54 }
 0x5f8   : > { %v1767_v2 = vpop.f32.mrf.mxu0 }
 0x5f9   : > { %2446 = vpow2.f32 %v1796_v35  ;;  %v1792_v34 = vmul.f32 1.442695, %v1783_v1  ;;  %v1788_v28 = vsub.f32 0.0, %v3417_v16  ;;  %v1768_v22 = vadd.f32 %v1767_v2, %v1698_v54 }
 0x5fa   : > { %v2254_v12 = vpop.f32.mrf.mxu0 }
 0x5fb   : > { %2448 = vpow2.f32 %v1792_v34  ;;  %v1802_v59 = vmul.f32 1.442695, %v1788_v28  ;;  %v1786_v61 = vsub.f32 0.0, %v1768_v22  ;;  %v1779_v41 = vadd.f32 %v2254_v12, %v1698_v54 }
 0x5fc   : > { %v1770_v45 = vpop.f32.mrf.mxu0 }
 0x5fd   : > { %2450 = vpow2.f32 %v1802_v59  ;;  %v1798_v44 = vmul.f32 1.442695, %v1786_v61  ;;  %v1789_v8 = vsub.f32 0.0, %v1779_v41  ;;  %v1771_v0 = vadd.f32 %v1770_v45, %v1698_v54  ;;  %v1946_v45 = vld [vmem:[%s3504_s9 + $0x10] sm:$0xff] }
 0x5ff   : > { %2452 = vpow2.f32 %v1798_v44  ;;  %v1804_v60 = vmul.f32 1.442695, %v1789_v8  ;;  %v1787_v9 = vsub.f32 0.0, %v1771_v0  ;;  %v1945_v44 = vld [vmem:[%s3504_s9 + $0x8] sm:$0xff]  ;;  %v1944_v8 = vld [vmem:[%s3504_s9] sm:$0xff] }
 0x601   : > { %2454 = vpow2.f32 %v1804_v60  ;;  %v1800_v14 = vmul.f32 1.442695, %v1787_v9 }
 0x602   : > { %v2443_v62 = vpop.eup %2442 }
 0x603   : > { %2456 = vpow2.f32 %v1800_v14  ;;  %v1808_v52 = vadd.f32 1.0, %v2443_v62 }
 0x604   : > { %v2445_v21 = vpop.eup %2444 }
 0x605   : > { %v1806_v4 = vadd.f32 1.0, %v2445_v21  ;;  %v386_v21 = vld [vmem:[%s3505_s10 + $0x8] sm:$0x1] }
 0x606   : > { %v2447_v29 = vpop.eup %2446 }
 0x607   : > { %2458 = vrcp.f32 %v1806_v4  ;;  %v1809_v49 = vadd.f32 1.0, %v2447_v29 }
 0x608   : > { %v2449_v32 = vpop.eup %2448  ;;  %2460 = vrcp.f32 %v1808_v52 }
 0x609   : > { %v1807_v10 = vadd.f32 1.0, %v2449_v32  ;;  %2462 = vrcp.f32 %v1809_v49 }
 0x60a   : > { %v2451_v27 = vpop.eup %2450 }
 0x60b   : > { %2464 = vrcp.f32 %v1807_v10  ;;  %v1812_v30 = vadd.f32 1.0, %v2451_v27 }
 0x60c   : > { %v2453_v42 = vpop.eup %2452 }
 0x60d   : > { %v1810_v31 = vadd.f32 1.0, %v2453_v42 }
 0x60e   : > { %v2455_v57 = vpop.eup %2454 }
 0x60f   : > { %2466 = vrcp.f32 %v1810_v31  ;;  %v1813_v47 = vadd.f32 1.0, %v2455_v57 }
 0x610   : > { %v2457_v63 = vpop.eup %2456  ;;  %2468 = vrcp.f32 %v1812_v30 }
 0x611   : > { %v1811_v17 = vadd.f32 1.0, %v2457_v63  ;;  %2470 = vrcp.f32 %v1813_v47 }
 0x613   : > { %2472 = vrcp.f32 %v1811_v17 }
 0x614   : > { %v2459_v26 = vpop.eup %2458 }
 0x615   : > { %v2461_v36 = vpop.eup %2460  ;;  %v1830_v33 = vmul.f32 %v2459_v26, %v3411_v43 }
 0x616   : > { %v2463_v46 = vpop.eup %2462  ;;  %v1832_v50 = vmul.f32 %v2461_v36, %v3408_v25 }
 0x617   : > { %v1838_v38 = vsel %vm719_vm2, %v1830_v33, 0.0  ;;  %v1833_v40 = vmul.f32 %v2463_v46, %v3414_v24 }
 0x618   : > { %v2465_v5 = vpop.eup %2464  ;;  %v1841_v3 = vsel %vm719_vm2, %v1832_v50, 0.0 }
 0x619   : > { %v1831_v39 = vmul.f32 %v2465_v5, %v1755_v15  ;;  %v1843_v43 = vsel %vm719_vm2, %v1833_v40, 0.0 }
 0x61b   : > { %v1839_v11 = vsel %vm719_vm2, %v1831_v39, 0.0 }
 0x61c   : > { %v2467_v37 = vpop.eup %2466  ;;  %v1840_v20 = vadd.f32 %v1839_v11, %v1838_v38 }
 0x61d   : > { %v1834_v54 = vmul.f32 %v2467_v37, %v1768_v22  ;;  %v2469_v51 = vpop.eup %2468 }
 0x61e   : > { %v1842_v58 = vadd.f32 %v1841_v3, %v1840_v20  ;;  %v2471_v56 = vpop.eup %2470  ;;  %v1836_v25 = vmul.f32 %v2469_v51, %v3417_v16 }
 0x61f   : > { %v1845_v6 = vsel %vm719_vm2, %v1834_v54, 0.0  ;;  %v1837_v53 = vmul.f32 %v2471_v56, %v1779_v41  ;;  %v1947_v41 = vld [vmem:[%s3504_s9 + $0x18] sm:$0xff] }
 0x620   : > { %v2473_v7 = vpop.eup %2472  ;;  %v1844_v48 = vadd.f32 %v1843_v43, %v1842_v58  ;;  %v1849_v18 = vsel %vm719_vm2, %v1836_v25, 0.0 }
 0x621   : > { %v1835_v19 = vmul.f32 %v2473_v7, %v1771_v0  ;;  %v1851_v1 = vsel %vm719_vm2, %v1837_v53, 0.0  ;;  %v1868_v0 = vrot.slane %v3325_v55, 7 }
 0x622   : > { %v1846_v24 = vadd.f32 %v1845_v6, %v1844_v48 }
 0x623   : > { %v1847_v13 = vsel %vm719_vm2, %v1835_v19, 0.0 }
 0x624   : > { %v1848_v15 = vadd.f32 %v1847_v13, %v1846_v24 }
 0x626   : > { %v1850_v35 = vadd.f32 %v1849_v18, %v1848_v15 }
 0x628   : > { %v1852_v2 = vadd.f32 %v1851_v1, %v1850_v35 }
 0x62a   : > { %v1853_v34 = vrot.slane %v1852_v2, 4 }
 0x62c   : > { %v1854_v28 = vadd.f32 %v1853_v34, %v1852_v2 }
 0x62e   : > { %v1855_v22 = vrot.slane %v1854_v28, 2 }
 0x630   : > { %v1856_v12 = vadd.f32 %v1855_v22, %v1854_v28 }
 0x632   : > { %v1857_v59 = vrot.slane %v1856_v12, 1 }
 0x634   : > { %v1858_v16 = vadd.f32 %v1857_v59, %v1856_v12 }
 0x636   : > { %v1859_v61 = vmul.f32 0.015625, %v1858_v16 }
 0x638   : > { %2272 = vmatmul.mubr.msk.f32.vlgmr.msra.gmra.mxu0 %vm719_vm2, %v1859_v61 }
 0x639   : > { %2275 = vmatpush3.msra.mxu0 %v1947_v41  ;;  %2282 = vmatprep.mubr.msk.f32.mxu0 %vm2538_vm4, %v3560_v23 }
 0x63a   : > { %2276 = vmatprep.subr.mxu0 %v3560_v23 }
 0x63b   : > { %2277 = vmatpush3.msra.mxu0 %v1946_v45 }
 0x63c   : > { %2278 = vmatprep.subr.mxu0 %v3560_v23 }
 0x63d   : > { %2279 = vmatpush3.msra.mxu0 %v1945_v44 }
 0x63e   : > { %2280 = vmatprep.subr.mxu0 %v3560_v23 }
 0x63f   : > { %2281 = vmatpush3.msra.mxu0 %v1944_v8 }
 0x6f8   : > { %v1939_v60 = vpop.f32.mrf.mxu0 }
 0x6f9   : > { %v1940_v9 = vadd.f32 %v1939_v60, %v1868_v0 }
 0x6fa   : > { %v2273_v14 = vpop.f32.mrf.mxu0 }
 0x6fb   : > { %v1943_v62 = vmax.f32 %v1940_v9, 0.0 }
 0x6fd   : > { %2283 = vmatmul.mubr.msk.f32.vlgmr.msra.gmra.mxu0 %vm435_vm0, %v1943_v62 }
 0x7bd   : > { %v2017_v52 = vpop.f32.mrf.mxu0 }
 0x7be   : > { %v2018_v23 = vadd.f32 %v2017_v52, %v386_v21 }
 0x7bf   : > { %v2284_v55 = vpop.f32.mrf.mxu0 }
 0x7c0   : > { %2022 = vst.msk [vmem:[%s378_s22] sm:$0x1] %vm2021_vm9, %v2018_v23 }
 0x7c1   : > { %2488 = shalt.err (!%p2485_p3)
}
 0x7c2   : > { %s2489_s16 = scalar_lea.hbm %s3460_s30, 16  ;;  %s2493_s25 = scalar_lea.hbm %s3506_s11, 32 }
 0x7c3   : > { %p2490_p4 = scmp.ne.s32.totalorder %s3460_s30, %s2489_s16  ;;  %p2494_p9 = scmp.lt.s32.totalorder %s3460_s30, %s3506_s11 }
 0x7c4   : > { %p2495_p10 = scmp.lt.s32.totalorder %s2493_s25, %s2489_s16 }
 0x7c5   : > { %p2491_p7 = pnand %p2490_p4, %p2638_p5 }
 0x7c6   : > { %p2496_p11 = por %p2495_p10, %p2494_p9 }
 0x7c7   : > { %p2492_p8 = pneg %p2491_p7 }
 0x7c9   : > { %p2497_p12 = pnand %p2496_p11, %p2492_p8 }
 0x7cb   : > { %2500 = shalt.err (!%p2497_p12)
}
 0x7cc   : > { %2285 = dma.vmem_to_hbm [thread:$0]  (%p2638_p5), %s2037_s24, 16, %s3460_s30, %s2024_s12  }
 0x7cd PF: > { %p2291_p13 = scmp.ge.s32.totalorder %s2535_s20, 2  ;;  %s2048_s0 = sand.u32 1, %s2523_s17  }
 0x7ce   : > { %s2049_s14 = scalar_lea.sflag [#allocation4], %s2048_s0 }
 0x7cf   : > { %p2288_p0 = pnand %p2291_p13, %p2642_p6 }
 0x7d1   : > { %p2289_p1 = pneg %p2288_p0 }
 0x7d3   : > { %2518 = dma.done.wait (%p2289_p1), %s2049_s14, 16  }
 0x7d4   : > { %2520 = vsyncadd (%p2289_p1), %s2049_s14, 4294967280  ;;  %p21_p2 = scmp.ge.s32.totalorder %s2625_s23, 4   ;;  %s3570_s17 = smov %s2527_s18 }
 0x7d5   : > { %s3571_s18 = smov %s2531_s19  ;;  %s3572_s19 = smov %s2636_s26 }
 0x7d6   : > { %s3573_s20 = smov %s2625_s23  ;;  %23 = sbr.rel (!%p21_p2) target bundleno = 5 (0x5), region = 100 }
 0x7db   :  { %2053 = vsyncpa [#allocation4], 1 }
 0x7dc   :  { %2055 = vsyncpa [#allocation4 + $0x1], 1 }

</bundles_post_ra>
